<compile_context>
chip_gen: v7x
topology: tpu7x:2x2x1
jax: 0.10.0
libtpu: 0.0.40
codegen_flags: <defaults>
</compile_context>

<pallas_src>
import math

import jax
import jax.numpy as jnp
from jax import lax
from jax.experimental import pallas as pl
from jax.experimental.pallas import tpu as pltpu

GAMMA = 1.0        # gamma of MP_LeNet(gamma, K)
K_PARAM = 5        # only used when normalize=True (it is False); kept for fidelity
SCALE = 0.01
NEG_BIG = -1e30    # padding sentinel along the pivot axis
VALID_THRESH = -1e29  # anything below this is padding

JC = 8             # pivot vregs processed per j-chunk
CI = 8             # stream vregs processed per i-chunk
SLOTS = 8 * 128    # problem slots per [8, 128] vreg tile


def _round_up(x, m):
    return ((x + m - 1) // m) * m


def _cdiv(a, b):
    return (a + b - 1) // b


_VMEM_CAP = None


def _vmem_cap():
    """Generation-aware VMEM budget (75% of physical; 48 MiB safe fallback)."""
    global _VMEM_CAP
    if _VMEM_CAP is None:
        try:
            cap = int(0.75 * pltpu.get_tpu_info().vmem_capacity_bytes)
        except Exception:
            cap = 48 * 1024 * 1024
        _VMEM_CAP = max(cap, 24 * 1024 * 1024)
    return _VMEM_CAP


# ----------------------------------------------------------------------------
# Pallas kernel.
#
# Inputs per grid step (b, g):
#   xj_ref: [Hq, 8, 128]  pivot values for this tile's pivot chunk (p, g);
#                         slot (sublane, lane) = flattened (partition p, problem m).
#   xi_ref: [Hi, 8, 128]  base stream a_c of the same problems (same slot map,
#                         independent of p / g); candidates are {+a_c, -a_c}.
# Outputs: run_k, run_theta  [8, 128] -- per-slot best (k, theta); the G*P pivot
# partitions are combined (max-k, matching theta) outside the kernel.
#
# Exactness incl. ties: cond has the same value across a tie block of the sorted
# sequence, n_j is always the LAST index of x_j's tie block, and equal n implies
# equal S, so max-n over cond-true j's reproduces torch's "last valid index" and
# its theta.  Stream zero-padding adds exactly 2*(x_j <= 0) per padded element to
# n and 0 to s, and is subtracted back exactly.  Padded pivots (== NEG_BIG) are
# masked explicitly.
# ----------------------------------------------------------------------------
def _make_mp_tau_kernel(Hq, Hi, gamma, strict, stream_pad):
    g = float(gamma)
    pad2 = 2.0 * float(stream_pad)
    nj = Hq // JC
    ni = Hi // CI

    def kernel(xj_ref, xi_ref, k_ref, t_ref):
        def jbody(jc, carry):
            run_k, run_t = carry
            js = pl.multiple_of(jc * JC, JC)
            xjc = xj_ref[pl.ds(js, JC), :, :]            # [JC, 8, 128]
            xj = [xjc[d] for d in range(JC)]             # JC live pivot vregs

            def ibody(ic, ns):
                n, s = ns
                n = list(n)
                s = list(s)
                ist = pl.multiple_of(ic * CI, CI)
                for di in range(CI):                     # static unroll
                    v = xi_ref[ist + di]                 # [8, 128], one vreg
                    nv = -v
                    for d in range(JC):                  # explicit per-vreg ops
                        m1 = (v >= xj[d]).astype(jnp.float32)
                        m2 = (nv >= xj[d]).astype(jnp.float32)
                        n[d] = n[d] + (m1 + m2)
                        s[d] = s[d] + v * (m1 - m2)
                return (tuple(n), tuple(s))

            zeros = tuple(jnp.zeros((8, 128), jnp.float32) for _ in range(JC))
            n, s = lax.fori_loop(0, ni, ibody, (zeros, zeros))

            for d in range(JC):                          # per-chunk epilogue
                xjd = xj[d]
                nd = n[d]
                if stream_pad:
                    # exact correction for the zero-padded stream elements
                    nd = nd - pad2 * (xjd <= 0.0).astype(jnp.float32)
                t = nd * xjd - s[d] + g
                cond = (t > 0.0) if strict else (t >= 0.0)
                cond = jnp.logical_and(cond, xjd > VALID_THRESH)  # drop padded pivots
                theta = (s[d] - g) / nd                  # nd >= 1 always (exact f32 div)
                kd = jnp.where(cond, nd, 0.0)
                better = kd > run_k                      # equal k => equal theta
                run_t = jnp.where(better, theta, run_t)
                run_k = jnp.where(better, kd, run_k)
            return (run_k, run_t)

        z = jnp.zeros((8, 128), jnp.float32)
        run_k, run_t = lax.fori_loop(0, nj, jbody, (z, z))
        k_ref[...] = run_k
        t_ref[...] = run_t

    return kernel


# ----------------------------------------------------------------------------
# tau for a batch of problems.  base: [N, C, O]; per problem (n, o) the candidate
# set is {+-base[n, c, o] : c}.  Returns tau: [N, O]  (0 where no valid k).
# ----------------------------------------------------------------------------
def _mp_tau_rows(base, gamma, strict):
    N, C, O = base.shape
    H = 2 * C
    M = N * O
    base = base.astype(jnp.float32)

    # problems flattened lane-dense: m = n*O + o
    bm = base.transpose(0, 2, 1).reshape(M, C)           # [M, C]

    # ---- layout parameters ---------------------------------------------------
    Hi = _round_up(C, CI)
    stream_pad = Hi - C
    # in-tile pivot-partition factor: fills the 1024 slots when M is small
    P = max(1, min(SLOTS // M, _cdiv(H, JC)))
    s_needed = P * M
    NB = _cdiv(s_needed, SLOTS)
    s_total = NB * SLOTS
    # >= 2 grid steps everywhere (and even where cheap) for v7x's 2 TensorCores
    G = 2 if (NB == 1 or (NB % 2 == 1 and H >= 256)) else 1
    Hq = _round_up(_cdiv(H, P * G), JC)

    # ---- stream tensor (plain-JAX layout plumbing) ----------------------------
    # xi[b, i, sub, lane] = bm[m(slot), i]; slot = b*1024 + sub*128 + lane = p*M + m
    bi = jnp.pad(bm, ((0, 0), (0, stream_pad)))                      # zero-pad stream
    bi = jnp.broadcast_to(bi[None], (P, M, Hi)).reshape(s_needed, Hi)
    bi = jnp.pad(bi, ((0, s_total - s_needed), (0, 0)))              # zero-pad slots
    xi = bi.reshape(NB, 8, 128, Hi).transpose(0, 3, 1, 2)            # [NB, Hi, 8, 128]

    # ---- pivot tensor: chunk (p, g) covers pivots [(p*G+g)*Hq, +Hq) ------------
    piv = jnp.concatenate([bm, -bm], axis=1)                          # [M, 2C]
    piv = jnp.pad(piv, ((0, 0), (0, P * G * Hq - H)),
                  constant_values=NEG_BIG)
    piv = piv.reshape(M, P, G, Hq).transpose(1, 0, 2, 3).reshape(s_needed, G, Hq)
    piv = jnp.pad(piv, ((0, s_total - s_needed), (0, 0), (0, 0)),
                  constant_values=NEG_BIG)
    xj = piv.reshape(NB, 8, 128, G, Hq).transpose(0, 3, 4, 1, 2)      # [NB, G, Hq, 8, 128]

    # ---- pallas call -----------------------------------------------------------
    vmem_bytes = int(min(_vmem_cap(),
                         2 * (Hq + Hi + 8) * SLOTS * 4 + (8 << 20)))
    kernel = _make_mp_tau_kernel(Hq, Hi, float(gamma), bool(strict), stream_pad)

    k_all, t_all = pl.pallas_call(
        kernel,
        out_shape=(jax.ShapeDtypeStruct((NB, G, 8, 128), jnp.float32),
                   jax.ShapeDtypeStruct((NB, G, 8, 128), jnp.float32)),
        grid=(NB, G),
        in_specs=[
            pl.BlockSpec((None, None, Hq, 8, 128), lambda b, g: (b, g, 0, 0, 0)),
            pl.BlockSpec((None, Hi, 8, 128), lambda b, g: (b, 0, 0, 0)),
        ],
        out_specs=(
            pl.BlockSpec((None, None, 8, 128), lambda b, g: (b, g, 0, 0)),
            pl.BlockSpec((None, None, 8, 128), lambda b, g: (b, g, 0, 0)),
        ),
        compiler_params=pltpu.CompilerParams(
            dimension_semantics=("parallel", "parallel"),
            vmem_limit_bytes=vmem_bytes),
    )(xj, xi)

    # ---- combine the G*P partial (k, theta) results per problem ----------------
    def unpack(a):
        a = a.transpose(1, 0, 2, 3).reshape(G, s_total)[:, :s_needed]
        return a.reshape(G, P, M).transpose(2, 0, 1).reshape(M, G * P)

    kk = unpack(k_all)
    tt = unpack(t_all)
    kbest = jnp.max(kk, axis=-1, keepdims=True)
    tau = jnp.max(jnp.where(kk == kbest, tt, NEG_BIG), axis=-1)
    tau = jnp.where(kbest[..., 0] > 0.0, tau, 0.0)
    return tau.reshape(N, O)


def mp_dual(feat, wmat, gamma, dmult, strict):
    """feat: [N, C] rows, wmat: [C, O].  Returns 0.5*gamma*dmult*(tau_P - tau_Q),
    where tau_P / tau_Q are the MP thresholds of {+-(x+w)} / {+-(x-w)}."""
    N = feat.shape[0]
    x = feat.astype(jnp.float32)[:, :, None]             # [N, C, 1]
    w = wmat.astype(jnp.float32)[None, :, :]              # [1, C, O]
    base = jnp.concatenate([x + w, x - w], axis=0)         # both duals stacked as rows
    tau = _mp_tau_rows(base, gamma, strict)                # [2N, O]
    return 0.5 * gamma * dmult * (tau[:N] - tau[N:])


# ----------------------------------------------------------------------------
# Plain-JAX glue: im2col, layer wrappers, relu/maxpool, parameter init.
# ----------------------------------------------------------------------------
def im2col(x, k, pad):
    B, C, H, W = x.shape
    Ho = H + 2 * pad - k + 1
    Wo = W + 2 * pad - k + 1
    xp = jnp.pad(x, ((0, 0), (0, 0), (pad, pad), (pad, pad)))
    cols = []
    for ki in range(k):
        for kj in range(k):
            cols.append(xp[:, :, ki:ki + Ho, kj:kj + Wo])   # [B, C, Ho, Wo]
    pat = jnp.stack(cols, axis=2)                           # [B, C, k*k, Ho, Wo]
    pat = pat.reshape(B, C * k * k, Ho * Wo)                # F.unfold order (c, ki, kj)
    return pat.transpose(0, 2, 1), Ho, Wo                   # [B, L, C*k*k]


def mp_conv2d(x, weight, gamma, k, pad):
    B = x.shape[0]
    O = weight.shape[0]
    pat, Ho, Wo = im2col(x, k, pad)
    L = Ho * Wo
    C = pat.shape[-1]                                       # C_in * k * k
    wmat = weight.reshape(O, C).T                           # [C, O]
    out = mp_dual(pat.reshape(B * L, C), wmat, gamma,
                  dmult=2.0 * C, strict=False)              # D = 2*C_in*k*k, ">="
    return out.reshape(B, L, O).transpose(0, 2, 1).reshape(B, O, Ho, Wo)


def mp_linear(x, weight, gamma):
    # x: [B, h1], weight: [h2, h1].  D = h1, MPLinear uses strict ">".
    return mp_dual(x, weight.T, gamma, dmult=float(x.shape[1]), strict=True)


def maxpool2(x):
    B, C, H, W = x.shape
    return x.reshape(B, C, H // 2, 2, W // 2, 2).max(axis=(3, 5))


def init_params(key):
    def xavier(k, shape, fan_in, fan_out):
        std = math.sqrt(2.0 / (fan_in + fan_out))
        return (std * jax.random.normal(k, shape)).astype(jnp.float32)
    ks = jax.random.split(key, 5)
    return {
        "conv1": xavier(ks[0], (6, 1, 5, 5), 1 * 25, 6 * 25),
        "conv2": xavier(ks[1], (16, 6, 5, 5), 6 * 25, 16 * 25),
        "conv3": xavier(ks[2], (120, 16, 5, 5), 16 * 25, 120 * 25),
        "conv4": xavier(ks[3], (84, 120, 3, 3), 120 * 9, 84 * 9),
        "fc": xavier(ks[4], (10, 84), 84, 10),
    }


@jax.jit
def mp_lenet_forward(params, x):
    # x: [B, 1, 24, 24] NCHW -> logits [B, 10]
    x = maxpool2(jax.nn.relu(SCALE * mp_conv2d(x, params["conv1"], GAMMA, 5, 2)))
    x = maxpool2(jax.nn.relu(SCALE * mp_conv2d(x, params["conv2"], GAMMA, 5, 2)))
    x = maxpool2(jax.nn.relu(SCALE * mp_conv2d(x, params["conv3"], GAMMA, 5, 2)))
    x = jax.nn.relu(SCALE * mp_conv2d(x, params["conv4"], GAMMA, 3, 0))
    x = x.reshape(x.shape[0], -1)                           # [B, 84]
    return mp_linear(x, params["fc"], GAMMA)


# ----------------------------------------------------------------------------
# Pure-JAX reference (sort/cumsum, mirrors the torch MP) for self-checks.
# ----------------------------------------------------------------------------
def mp_dual_ref(feat, wmat, gamma, dmult, strict):
    x = feat[:, :, None].astype(jnp.float32)
    w = wmat[None, :, :].astype(jnp.float32)
    p = jnp.concatenate([x + w, -x - w], axis=1)
    q = jnp.concatenate([x - w, -x + w], axis=1)

    def tau(t):
        s = jnp.sort(t, axis=1)[:, ::-1, :]
        c = jnp.cumsum(s, axis=1)
        idx = jnp.arange(1, t.shape[1] + 1, dtype=t.dtype)[None, :, None]
        th = (c - gamma) / idx
        cond = (s - th > 0) if strict else (s - th >= 0)
        kk = jnp.max(jnp.where(cond, idx, 0.0), axis=1)
        kidx = jnp.maximum(kk.astype(jnp.int32) - 1, 0)
        thk = jnp.take_along_axis(th, kidx[:, None, :], axis=1)[:, 0, :]
        return jnp.where(kk > 0, thk, 0.0)

    return 0.5 * gamma * dmult * (tau(p) - tau(q))


def _check(got, want, atol, rtol, tag):
    if not bool(jnp.allclose(got, want, atol=atol, rtol=rtol)):
        raise AssertionError(f"mp_dual self-check failed ({tag}): {got} vs {want}")


def _self_check(key):
    ks = jax.random.split(key, 6)

    # (a) generic small case, both cond conventions (conv ">=", linear ">")
    feat = jax.random.normal(ks[0], (5, 7), dtype=jnp.float32)
    wmat = jax.random.normal(ks[1], (7, 3), dtype=jnp.float32) * 0.3
    for strict, dmult in ((False, 14.0), (True, 7.0)):
        _check(mp_dual(feat, wmat, GAMMA, dmult, strict),
               mp_dual_ref(feat, wmat, GAMMA, dmult, strict),
               2e-4, 2e-4, f"generic strict={strict}")

    # (b) heavily tied inputs (zeros + duplicated columns/weights), exercises the
    #     tie-invariance of the rank-count formulation and the P>1 slot packing.
    base = jax.random.normal(ks[2], (3, 2), dtype=jnp.float32)
    featt = jnp.concatenate([jnp.zeros((3, 2), jnp.float32), base, base], axis=1)
    w1 = jax.random.normal(ks[3], (2, 2), dtype=jnp.float32) * 0.5
    w2 = jax.random.normal(ks[4], (2, 2), dtype=jnp.float32) * 0.5
    wt = jnp.concatenate([w1, w2, w2], axis=0)
    for strict in (False, True):
        _check(mp_dual(featt, wt, GAMMA, 12.0, strict),
               mp_dual_ref(featt, wt, GAMMA, 12.0, strict),
               2e-4, 2e-4, f"tied strict={strict}")

    # (c) large candidate count: exercises the G=2 grid split + pivot partitions
    #     + stream/pivot padding, i.e. the conv3/conv4 code path.
    kl1, kl2 = jax.random.split(ks[5])
    featl = jax.random.normal(kl1, (3, 300), dtype=jnp.float32)
    wl = jax.random.normal(kl2, (300, 5), dtype=jnp.float32) * 0.1
    _check(mp_dual(featl, wl, GAMMA, 600.0, False),
           mp_dual_ref(featl, wl, GAMMA, 600.0, False),
           1e-2, 1e-3, "large-H")


if __name__ == "__main__":
    key = jax.random.PRNGKey(0)
    kp, kx, kc = jax.random.split(key, 3)

    params = init_params(kp)
    # 24x24 is the smallest spatial size consistent with the module: the flatten
    # must feed fc(84 -> 10): 24 -> pool 12 -> pool 6 -> pool 3 -> conv4(k=3) -> 1x1.
    x = jax.random.normal(kx, (2, 1, 24, 24), dtype=jnp.float32)

    _self_check(kc)

    out = mp_lenet_forward(params, x)
    out = jax.block_until_ready(out)
    assert out.shape == (2, 10), out.shape
    assert bool(jnp.all(jnp.isfinite(out)))
    print("KERNEL_OK")
</pallas_src>

<mosaic_0001>
module attributes {stable_mosaic.version = 11 : i64} {
  func.func @kernel(%arg0: i32, %arg1: i32, %arg2: memref<1x1x8x8x128xf32, #tpu.memory_space<vmem>>, %arg3: memref<1x8x8x128xf32, #tpu.memory_space<vmem>>, %arg4: memref<1x1x8x128xf32, #tpu.memory_space<vmem>>, %arg5: memref<1x1x8x128xf32, #tpu.memory_space<vmem>>) attributes {dimension_semantics = [#tpu.dimension_semantics<parallel>, #tpu.dimension_semantics<parallel>], iteration_bounds = array<i64: 1, 2>, scalar_prefetch = 0 : i64, scratch_operands = 0 : i64, tpu.core_type = #tpu.core_type<tc>, window_params = [{transform_indices = @transform_0, window_bounds = array<i64: 1, 1, 8, 8, 128>}, {transform_indices = @transform_1, window_bounds = array<i64: 1, 8, 8, 128>}, {transform_indices = @transform_2, window_bounds = array<i64: 1, 1, 8, 128>}, {transform_indices = @transform_3, window_bounds = array<i64: 1, 1, 8, 128>}]} {
    %cst = arith.constant 0.000000e+00 : f32
    %0 = vector.broadcast %cst : f32 to vector<8x128xf32>
    %c0_i32 = arith.constant 0 : i32
    %c8_i32 = arith.constant 8 : i32
    %1 = arith.muli %c0_i32, %c8_i32 : i32
    %2 = tpu.assume_multiple %1, 8 : i32
    %c0 = arith.constant 0 : index
    %c0_0 = arith.constant 0 : index
    %3 = arith.index_cast %2 : i32 to index
    %c0_1 = arith.constant 0 : index
    %c0_2 = arith.constant 0 : index
    %4 = vector.load %arg2[%c0, %c0_0, %3, %c0_1, %c0_2] : memref<1x1x8x8x128xf32, #tpu.memory_space<vmem>>, vector<1x1x8x8x128xf32>
    %5 = vector.shape_cast %4 : vector<1x1x8x8x128xf32> to vector<8x8x128xf32>
    %6 = vector.extract_strided_slice %5 {offsets = [0, 0, 0], sizes = [1, 8, 128], strides = [1, 1, 1]} : vector<8x8x128xf32> to vector<1x8x128xf32>
    %7 = vector.shape_cast %6 : vector<1x8x128xf32> to vector<8x128xf32>
    %8 = vector.extract_strided_slice %5 {offsets = [1, 0, 0], sizes = [1, 8, 128], strides = [1, 1, 1]} : vector<8x8x128xf32> to vector<1x8x128xf32>
    %9 = vector.shape_cast %8 : vector<1x8x128xf32> to vector<8x128xf32>
    %10 = vector.extract_strided_slice %5 {offsets = [2, 0, 0], sizes = [1, 8, 128], strides = [1, 1, 1]} : vector<8x8x128xf32> to vector<1x8x128xf32>
    %11 = vector.shape_cast %10 : vector<1x8x128xf32> to vector<8x128xf32>
    %12 = vector.extract_strided_slice %5 {offsets = [3, 0, 0], sizes = [1, 8, 128], strides = [1, 1, 1]} : vector<8x8x128xf32> to vector<1x8x128xf32>
    %13 = vector.shape_cast %12 : vector<1x8x128xf32> to vector<8x128xf32>
    %14 = vector.extract_strided_slice %5 {offsets = [4, 0, 0], sizes = [1, 8, 128], strides = [1, 1, 1]} : vector<8x8x128xf32> to vector<1x8x128xf32>
    %15 = vector.shape_cast %14 : vector<1x8x128xf32> to vector<8x128xf32>
    %16 = vector.extract_strided_slice %5 {offsets = [5, 0, 0], sizes = [1, 8, 128], strides = [1, 1, 1]} : vector<8x8x128xf32> to vector<1x8x128xf32>
    %17 = vector.shape_cast %16 : vector<1x8x128xf32> to vector<8x128xf32>
    %18 = vector.extract_strided_slice %5 {offsets = [6, 0, 0], sizes = [1, 8, 128], strides = [1, 1, 1]} : vector<8x8x128xf32> to vector<1x8x128xf32>
    %19 = vector.shape_cast %18 : vector<1x8x128xf32> to vector<8x128xf32>
    %20 = vector.extract_strided_slice %5 {offsets = [7, 0, 0], sizes = [1, 8, 128], strides = [1, 1, 1]} : vector<8x8x128xf32> to vector<1x8x128xf32>
    %21 = vector.shape_cast %20 : vector<1x8x128xf32> to vector<8x128xf32>
    %cst_3 = arith.constant 0.000000e+00 : f32
    %22 = vector.broadcast %cst_3 : f32 to vector<8x128xf32>
    %cst_4 = arith.constant 0.000000e+00 : f32
    %23 = vector.broadcast %cst_4 : f32 to vector<8x128xf32>
    %cst_5 = arith.constant 0.000000e+00 : f32
    %24 = vector.broadcast %cst_5 : f32 to vector<8x128xf32>
    %cst_6 = arith.constant 0.000000e+00 : f32
    %25 = vector.broadcast %cst_6 : f32 to vector<8x128xf32>
    %cst_7 = arith.constant 0.000000e+00 : f32
    %26 = vector.broadcast %cst_7 : f32 to vector<8x128xf32>
    %cst_8 = arith.constant 0.000000e+00 : f32
    %27 = vector.broadcast %cst_8 : f32 to vector<8x128xf32>
    %cst_9 = arith.constant 0.000000e+00 : f32
    %28 = vector.broadcast %cst_9 : f32 to vector<8x128xf32>
    %cst_10 = arith.constant 0.000000e+00 : f32
    %29 = vector.broadcast %cst_10 : f32 to vector<8x128xf32>
    %c0_i32_11 = arith.constant 0 : i32
    %c8_i32_12 = arith.constant 8 : i32
    %30 = arith.muli %c0_i32_11, %c8_i32_12 : i32
    %31 = tpu.assume_multiple %30, 8 : i32
    %c0_i32_13 = arith.constant 0 : i32
    %32 = arith.addi %31, %c0_i32_13 : i32
    %c0_14 = arith.constant 0 : index
    %33 = arith.index_cast %32 : i32 to index
    %c0_15 = arith.constant 0 : index
    %c0_16 = arith.constant 0 : index
    %34 = vector.load %arg3[%c0_14, %33, %c0_15, %c0_16] : memref<1x8x8x128xf32, #tpu.memory_space<vmem>>, vector<1x1x8x128xf32>
    %35 = vector.shape_cast %34 : vector<1x1x8x128xf32> to vector<8x128xf32>
    %cst_17 = arith.constant 0.000000e+00 : f32
    %36 = vector.broadcast %cst_17 : f32 to vector<8x128xf32>
    %37 = arith.subf %36, %35 : vector<8x128xf32>
    %38 = arith.cmpf oge, %35, %7 : vector<8x128xf32>
    %39 = arith.extui %38 : vector<8x128xi1> to vector<8x128xi32>
    %40 = arith.sitofp %39 : vector<8x128xi32> to vector<8x128xf32>
    %41 = arith.cmpf oge, %37, %7 : vector<8x128xf32>
    %42 = arith.extui %41 : vector<8x128xi1> to vector<8x128xi32>
    %43 = arith.sitofp %42 : vector<8x128xi32> to vector<8x128xf32>
    %44 = arith.addf %40, %43 : vector<8x128xf32>
    %45 = arith.addf %22, %44 : vector<8x128xf32>
    %46 = arith.subf %40, %43 : vector<8x128xf32>
    %47 = arith.mulf %35, %46 : vector<8x128xf32>
    %48 = arith.addf %22, %47 : vector<8x128xf32>
    %49 = arith.cmpf oge, %35, %9 : vector<8x128xf32>
    %50 = arith.extui %49 : vector<8x128xi1> to vector<8x128xi32>
    %51 = arith.sitofp %50 : vector<8x128xi32> to vector<8x128xf32>
    %52 = arith.cmpf oge, %37, %9 : vector<8x128xf32>
    %53 = arith.extui %52 : vector<8x128xi1> to vector<8x128xi32>
    %54 = arith.sitofp %53 : vector<8x128xi32> to vector<8x128xf32>
    %55 = arith.addf %51, %54 : vector<8x128xf32>
    %56 = arith.addf %23, %55 : vector<8x128xf32>
    %57 = arith.subf %51, %54 : vector<8x128xf32>
    %58 = arith.mulf %35, %57 : vector<8x128xf32>
    %59 = arith.addf %23, %58 : vector<8x128xf32>
    %60 = arith.cmpf oge, %35, %11 : vector<8x128xf32>
    %61 = arith.extui %60 : vector<8x128xi1> to vector<8x128xi32>
    %62 = arith.sitofp %61 : vector<8x128xi32> to vector<8x128xf32>
    %63 = arith.cmpf oge, %37, %11 : vector<8x128xf32>
    %64 = arith.extui %63 : vector<8x128xi1> to vector<8x128xi32>
    %65 = arith.sitofp %64 : vector<8x128xi32> to vector<8x128xf32>
    %66 = arith.addf %62, %65 : vector<8x128xf32>
    %67 = arith.addf %24, %66 : vector<8x128xf32>
    %68 = arith.subf %62, %65 : vector<8x128xf32>
    %69 = arith.mulf %35, %68 : vector<8x128xf32>
    %70 = arith.addf %24, %69 : vector<8x128xf32>
    %71 = arith.cmpf oge, %35, %13 : vector<8x128xf32>
    %72 = arith.extui %71 : vector<8x128xi1> to vector<8x128xi32>
    %73 = arith.sitofp %72 : vector<8x128xi32> to vector<8x128xf32>
    %74 = arith.cmpf oge, %37, %13 : vector<8x128xf32>
    %75 = arith.extui %74 : vector<8x128xi1> to vector<8x128xi32>
    %76 = arith.sitofp %75 : vector<8x128xi32> to vector<8x128xf32>
    %77 = arith.addf %73, %76 : vector<8x128xf32>
    %78 = arith.addf %25, %77 : vector<8x128xf32>
    %79 = arith.subf %73, %76 : vector<8x128xf32>
    %80 = arith.mulf %35, %79 : vector<8x128xf32>
    %81 = arith.addf %25, %80 : vector<8x128xf32>
    %82 = arith.cmpf oge, %35, %15 : vector<8x128xf32>
    %83 = arith.extui %82 : vector<8x128xi1> to vector<8x128xi32>
    %84 = arith.sitofp %83 : vector<8x128xi32> to vector<8x128xf32>
    %85 = arith.cmpf oge, %37, %15 : vector<8x128xf32>
    %86 = arith.extui %85 : vector<8x128xi1> to vector<8x128xi32>
    %87 = arith.sitofp %86 : vector<8x128xi32> to vector<8x128xf32>
    %88 = arith.addf %84, %87 : vector<8x128xf32>
    %89 = arith.addf %26, %88 : vector<8x128xf32>
    %90 = arith.subf %84, %87 : vector<8x128xf32>
    %91 = arith.mulf %35, %90 : vector<8x128xf32>
    %92 = arith.addf %26, %91 : vector<8x128xf32>
    %93 = arith.cmpf oge, %35, %17 : vector<8x128xf32>
    %94 = arith.extui %93 : vector<8x128xi1> to vector<8x128xi32>
    %95 = arith.sitofp %94 : vector<8x128xi32> to vector<8x128xf32>
    %96 = arith.cmpf oge, %37, %17 : vector<8x128xf32>
    %97 = arith.extui %96 : vector<8x128xi1> to vector<8x128xi32>
    %98 = arith.sitofp %97 : vector<8x128xi32> to vector<8x128xf32>
    %99 = arith.addf %95, %98 : vector<8x128xf32>
    %100 = arith.addf %27, %99 : vector<8x128xf32>
    %101 = arith.subf %95, %98 : vector<8x128xf32>
    %102 = arith.mulf %35, %101 : vector<8x128xf32>
    %103 = arith.addf %27, %102 : vector<8x128xf32>
    %104 = arith.cmpf oge, %35, %19 : vector<8x128xf32>
    %105 = arith.extui %104 : vector<8x128xi1> to vector<8x128xi32>
    %106 = arith.sitofp %105 : vector<8x128xi32> to vector<8x128xf32>
    %107 = arith.cmpf oge, %37, %19 : vector<8x128xf32>
    %108 = arith.extui %107 : vector<8x128xi1> to vector<8x128xi32>
    %109 = arith.sitofp %108 : vector<8x128xi32> to vector<8x128xf32>
    %110 = arith.addf %106, %109 : vector<8x128xf32>
    %111 = arith.addf %28, %110 : vector<8x128xf32>
    %112 = arith.subf %106, %109 : vector<8x128xf32>
    %113 = arith.mulf %35, %112 : vector<8x128xf32>
    %114 = arith.addf %28, %113 : vector<8x128xf32>
    %115 = arith.cmpf oge, %35, %21 : vector<8x128xf32>
    %116 = arith.extui %115 : vector<8x128xi1> to vector<8x128xi32>
    %117 = arith.sitofp %116 : vector<8x128xi32> to vector<8x128xf32>
    %118 = arith.cmpf oge, %37, %21 : vector<8x128xf32>
    %119 = arith.extui %118 : vector<8x128xi1> to vector<8x128xi32>
    %120 = arith.sitofp %119 : vector<8x128xi32> to vector<8x128xf32>
    %121 = arith.addf %117, %120 : vector<8x128xf32>
    %122 = arith.addf %29, %121 : vector<8x128xf32>
    %123 = arith.subf %117, %120 : vector<8x128xf32>
    %124 = arith.mulf %35, %123 : vector<8x128xf32>
    %125 = arith.addf %29, %124 : vector<8x128xf32>
    %c1_i32 = arith.constant 1 : i32
    %126 = arith.addi %31, %c1_i32 : i32
    %c0_18 = arith.constant 0 : index
    %127 = arith.index_cast %126 : i32 to index
    %c0_19 = arith.constant 0 : index
    %c0_20 = arith.constant 0 : index
    %128 = vector.load %arg3[%c0_18, %127, %c0_19, %c0_20] : memref<1x8x8x128xf32, #tpu.memory_space<vmem>>, vector<1x1x8x128xf32>
    %129 = vector.shape_cast %128 : vector<1x1x8x128xf32> to vector<8x128xf32>
    %cst_21 = arith.constant 0.000000e+00 : f32
    %130 = vector.broadcast %cst_21 : f32 to vector<8x128xf32>
    %131 = arith.subf %130, %129 : vector<8x128xf32>
    %132 = arith.cmpf oge, %129, %7 : vector<8x128xf32>
    %133 = arith.extui %132 : vector<8x128xi1> to vector<8x128xi32>
    %134 = arith.sitofp %133 : vector<8x128xi32> to vector<8x128xf32>
    %135 = arith.cmpf oge, %131, %7 : vector<8x128xf32>
    %136 = arith.extui %135 : vector<8x128xi1> to vector<8x128xi32>
    %137 = arith.sitofp %136 : vector<8x128xi32> to vector<8x128xf32>
    %138 = arith.addf %134, %137 : vector<8x128xf32>
    %139 = arith.addf %45, %138 : vector<8x128xf32>
    %140 = arith.subf %134, %137 : vector<8x128xf32>
    %141 = arith.mulf %129, %140 : vector<8x128xf32>
    %142 = arith.addf %48, %141 : vector<8x128xf32>
    %143 = arith.cmpf oge, %129, %9 : vector<8x128xf32>
    %144 = arith.extui %143 : vector<8x128xi1> to vector<8x128xi32>
    %145 = arith.sitofp %144 : vector<8x128xi32> to vector<8x128xf32>
    %146 = arith.cmpf oge, %131, %9 : vector<8x128xf32>
    %147 = arith.extui %146 : vector<8x128xi1> to vector<8x128xi32>
    %148 = arith.sitofp %147 : vector<8x128xi32> to vector<8x128xf32>
    %149 = arith.addf %145, %148 : vector<8x128xf32>
    %150 = arith.addf %56, %149 : vector<8x128xf32>
    %151 = arith.subf %145, %148 : vector<8x128xf32>
    %152 = arith.mulf %129, %151 : vector<8x128xf32>
    %153 = arith.addf %59, %152 : vector<8x128xf32>
    %154 = arith.cmpf oge, %129, %11 : vector<8x128xf32>
    %155 = arith.extui %154 : vector<8x128xi1> to vector<8x128xi32>
    %156 = arith.sitofp %155 : vector<8x128xi32> to vector<8x128xf32>
    %157 = arith.cmpf oge, %131, %11 : vector<8x128xf32>
    %158 = arith.extui %157 : vector<8x128xi1> to vector<8x128xi32>
    %159 = arith.sitofp %158 : vector<8x128xi32> to vector<8x128xf32>
    %160 = arith.addf %156, %159 : vector<8x128xf32>
    %161 = arith.addf %67, %160 : vector<8x128xf32>
    %162 = arith.subf %156, %159 : vector<8x128xf32>
    %163 = arith.mulf %129, %162 : vector<8x128xf32>
    %164 = arith.addf %70, %163 : vector<8x128xf32>
    %165 = arith.cmpf oge, %129, %13 : vector<8x128xf32>
    %166 = arith.extui %165 : vector<8x128xi1> to vector<8x128xi32>
    %167 = arith.sitofp %166 : vector<8x128xi32> to vector<8x128xf32>
    %168 = arith.cmpf oge, %131, %13 : vector<8x128xf32>
    %169 = arith.extui %168 : vector<8x128xi1> to vector<8x128xi32>
    %170 = arith.sitofp %169 : vector<8x128xi32> to vector<8x128xf32>
    %171 = arith.addf %167, %170 : vector<8x128xf32>
    %172 = arith.addf %78, %171 : vector<8x128xf32>
    %173 = arith.subf %167, %170 : vector<8x128xf32>
    %174 = arith.mulf %129, %173 : vector<8x128xf32>
    %175 = arith.addf %81, %174 : vector<8x128xf32>
    %176 = arith.cmpf oge, %129, %15 : vector<8x128xf32>
    %177 = arith.extui %176 : vector<8x128xi1> to vector<8x128xi32>
    %178 = arith.sitofp %177 : vector<8x128xi32> to vector<8x128xf32>
    %179 = arith.cmpf oge, %131, %15 : vector<8x128xf32>
    %180 = arith.extui %179 : vector<8x128xi1> to vector<8x128xi32>
    %181 = arith.sitofp %180 : vector<8x128xi32> to vector<8x128xf32>
    %182 = arith.addf %178, %181 : vector<8x128xf32>
    %183 = arith.addf %89, %182 : vector<8x128xf32>
    %184 = arith.subf %178, %181 : vector<8x128xf32>
    %185 = arith.mulf %129, %184 : vector<8x128xf32>
    %186 = arith.addf %92, %185 : vector<8x128xf32>
    %187 = arith.cmpf oge, %129, %17 : vector<8x128xf32>
    %188 = arith.extui %187 : vector<8x128xi1> to vector<8x128xi32>
    %189 = arith.sitofp %188 : vector<8x128xi32> to vector<8x128xf32>
    %190 = arith.cmpf oge, %131, %17 : vector<8x128xf32>
    %191 = arith.extui %190 : vector<8x128xi1> to vector<8x128xi32>
    %192 = arith.sitofp %191 : vector<8x128xi32> to vector<8x128xf32>
    %193 = arith.addf %189, %192 : vector<8x128xf32>
    %194 = arith.addf %100, %193 : vector<8x128xf32>
    %195 = arith.subf %189, %192 : vector<8x128xf32>
    %196 = arith.mulf %129, %195 : vector<8x128xf32>
    %197 = arith.addf %103, %196 : vector<8x128xf32>
    %198 = arith.cmpf oge, %129, %19 : vector<8x128xf32>
    %199 = arith.extui %198 : vector<8x128xi1> to vector<8x128xi32>
    %200 = arith.sitofp %199 : vector<8x128xi32> to vector<8x128xf32>
    %201 = arith.cmpf oge, %131, %19 : vector<8x128xf32>
    %202 = arith.extui %201 : vector<8x128xi1> to vector<8x128xi32>
    %203 = arith.sitofp %202 : vector<8x128xi32> to vector<8x128xf32>
    %204 = arith.addf %200, %203 : vector<8x128xf32>
    %205 = arith.addf %111, %204 : vector<8x128xf32>
    %206 = arith.subf %200, %203 : vector<8x128xf32>
    %207 = arith.mulf %129, %206 : vector<8x128xf32>
    %208 = arith.addf %114, %207 : vector<8x128xf32>
    %209 = arith.cmpf oge, %129, %21 : vector<8x128xf32>
    %210 = arith.extui %209 : vector<8x128xi1> to vector<8x128xi32>
    %211 = arith.sitofp %210 : vector<8x128xi32> to vector<8x128xf32>
    %212 = arith.cmpf oge, %131, %21 : vector<8x128xf32>
    %213 = arith.extui %212 : vector<8x128xi1> to vector<8x128xi32>
    %214 = arith.sitofp %213 : vector<8x128xi32> to vector<8x128xf32>
    %215 = arith.addf %211, %214 : vector<8x128xf32>
    %216 = arith.addf %122, %215 : vector<8x128xf32>
    %217 = arith.subf %211, %214 : vector<8x128xf32>
    %218 = arith.mulf %129, %217 : vector<8x128xf32>
    %219 = arith.addf %125, %218 : vector<8x128xf32>
    %c2_i32 = arith.constant 2 : i32
    %220 = arith.addi %31, %c2_i32 : i32
    %c0_22 = arith.constant 0 : index
    %221 = arith.index_cast %220 : i32 to index
    %c0_23 = arith.constant 0 : index
    %c0_24 = arith.constant 0 : index
    %222 = vector.load %arg3[%c0_22, %221, %c0_23, %c0_24] : memref<1x8x8x128xf32, #tpu.memory_space<vmem>>, vector<1x1x8x128xf32>
    %223 = vector.shape_cast %222 : vector<1x1x8x128xf32> to vector<8x128xf32>
    %cst_25 = arith.constant 0.000000e+00 : f32
    %224 = vector.broadcast %cst_25 : f32 to vector<8x128xf32>
    %225 = arith.subf %224, %223 : vector<8x128xf32>
    %226 = arith.cmpf oge, %223, %7 : vector<8x128xf32>
    %227 = arith.extui %226 : vector<8x128xi1> to vector<8x128xi32>
    %228 = arith.sitofp %227 : vector<8x128xi32> to vector<8x128xf32>
    %229 = arith.cmpf oge, %225, %7 : vector<8x128xf32>
    %230 = arith.extui %229 : vector<8x128xi1> to vector<8x128xi32>
    %231 = arith.sitofp %230 : vector<8x128xi32> to vector<8x128xf32>
    %232 = arith.addf %228, %231 : vector<8x128xf32>
    %233 = arith.addf %139, %232 : vector<8x128xf32>
    %234 = arith.subf %228, %231 : vector<8x128xf32>
    %235 = arith.mulf %223, %234 : vector<8x128xf32>
    %236 = arith.addf %142, %235 : vector<8x128xf32>
    %237 = arith.cmpf oge, %223, %9 : vector<8x128xf32>
    %238 = arith.extui %237 : vector<8x128xi1> to vector<8x128xi32>
    %239 = arith.sitofp %238 : vector<8x128xi32> to vector<8x128xf32>
    %240 = arith.cmpf oge, %225, %9 : vector<8x128xf32>
    %241 = arith.extui %240 : vector<8x128xi1> to vector<8x128xi32>
    %242 = arith.sitofp %241 : vector<8x128xi32> to vector<8x128xf32>
    %243 = arith.addf %239, %242 : vector<8x128xf32>
    %244 = arith.addf %150, %243 : vector<8x128xf32>
    %245 = arith.subf %239, %242 : vector<8x128xf32>
    %246 = arith.mulf %223, %245 : vector<8x128xf32>
    %247 = arith.addf %153, %246 : vector<8x128xf32>
    %248 = arith.cmpf oge, %223, %11 : vector<8x128xf32>
    %249 = arith.extui %248 : vector<8x128xi1> to vector<8x128xi32>
    %250 = arith.sitofp %249 : vector<8x128xi32> to vector<8x128xf32>
    %251 = arith.cmpf oge, %225, %11 : vector<8x128xf32>
    %252 = arith.extui %251 : vector<8x128xi1> to vector<8x128xi32>
    %253 = arith.sitofp %252 : vector<8x128xi32> to vector<8x128xf32>
    %254 = arith.addf %250, %253 : vector<8x128xf32>
    %255 = arith.addf %161, %254 : vector<8x128xf32>
    %256 = arith.subf %250, %253 : vector<8x128xf32>
    %257 = arith.mulf %223, %256 : vector<8x128xf32>
    %258 = arith.addf %164, %257 : vector<8x128xf32>
    %259 = arith.cmpf oge, %223, %13 : vector<8x128xf32>
    %260 = arith.extui %259 : vector<8x128xi1> to vector<8x128xi32>
    %261 = arith.sitofp %260 : vector<8x128xi32> to vector<8x128xf32>
    %262 = arith.cmpf oge, %225, %13 : vector<8x128xf32>
    %263 = arith.extui %262 : vector<8x128xi1> to vector<8x128xi32>
    %264 = arith.sitofp %263 : vector<8x128xi32> to vector<8x128xf32>
    %265 = arith.addf %261, %264 : vector<8x128xf32>
    %266 = arith.addf %172, %265 : vector<8x128xf32>
    %267 = arith.subf %261, %264 : vector<8x128xf32>
    %268 = arith.mulf %223, %267 : vector<8x128xf32>
    %269 = arith.addf %175, %268 : vector<8x128xf32>
    %270 = arith.cmpf oge, %223, %15 : vector<8x128xf32>
    %271 = arith.extui %270 : vector<8x128xi1> to vector<8x128xi32>
    %272 = arith.sitofp %271 : vector<8x128xi32> to vector<8x128xf32>
    %273 = arith.cmpf oge, %225, %15 : vector<8x128xf32>
    %274 = arith.extui %273 : vector<8x128xi1> to vector<8x128xi32>
    %275 = arith.sitofp %274 : vector<8x128xi32> to vector<8x128xf32>
    %276 = arith.addf %272, %275 : vector<8x128xf32>
    %277 = arith.addf %183, %276 : vector<8x128xf32>
    %278 = arith.subf %272, %275 : vector<8x128xf32>
    %279 = arith.mulf %223, %278 : vector<8x128xf32>
    %280 = arith.addf %186, %279 : vector<8x128xf32>
    %281 = arith.cmpf oge, %223, %17 : vector<8x128xf32>
    %282 = arith.extui %281 : vector<8x128xi1> to vector<8x128xi32>
    %283 = arith.sitofp %282 : vector<8x128xi32> to vector<8x128xf32>
    %284 = arith.cmpf oge, %225, %17 : vector<8x128xf32>
    %285 = arith.extui %284 : vector<8x128xi1> to vector<8x128xi32>
    %286 = arith.sitofp %285 : vector<8x128xi32> to vector<8x128xf32>
    %287 = arith.addf %283, %286 : vector<8x128xf32>
    %288 = arith.addf %194, %287 : vector<8x128xf32>
    %289 = arith.subf %283, %286 : vector<8x128xf32>
    %290 = arith.mulf %223, %289 : vector<8x128xf32>
    %291 = arith.addf %197, %290 : vector<8x128xf32>
    %292 = arith.cmpf oge, %223, %19 : vector<8x128xf32>
    %293 = arith.extui %292 : vector<8x128xi1> to vector<8x128xi32>
    %294 = arith.sitofp %293 : vector<8x128xi32> to vector<8x128xf32>
    %295 = arith.cmpf oge, %225, %19 : vector<8x128xf32>
    %296 = arith.extui %295 : vector<8x128xi1> to vector<8x128xi32>
    %297 = arith.sitofp %296 : vector<8x128xi32> to vector<8x128xf32>
    %298 = arith.addf %294, %297 : vector<8x128xf32>
    %299 = arith.addf %205, %298 : vector<8x128xf32>
    %300 = arith.subf %294, %297 : vector<8x128xf32>
    %301 = arith.mulf %223, %300 : vector<8x128xf32>
    %302 = arith.addf %208, %301 : vector<8x128xf32>
    %303 = arith.cmpf oge, %223, %21 : vector<8x128xf32>
    %304 = arith.extui %303 : vector<8x128xi1> to vector<8x128xi32>
    %305 = arith.sitofp %304 : vector<8x128xi32> to vector<8x128xf32>
    %306 = arith.cmpf oge, %225, %21 : vector<8x128xf32>
    %307 = arith.extui %306 : vector<8x128xi1> to vector<8x128xi32>
    %308 = arith.sitofp %307 : vector<8x128xi32> to vector<8x128xf32>
    %309 = arith.addf %305, %308 : vector<8x128xf32>
    %310 = arith.addf %216, %309 : vector<8x128xf32>
    %311 = arith.subf %305, %308 : vector<8x128xf32>
    %312 = arith.mulf %223, %311 : vector<8x128xf32>
    %313 = arith.addf %219, %312 : vector<8x128xf32>
    %c3_i32 = arith.constant 3 : i32
    %314 = arith.addi %31, %c3_i32 : i32
    %c0_26 = arith.constant 0 : index
    %315 = arith.index_cast %314 : i32 to index
    %c0_27 = arith.constant 0 : index
    %c0_28 = arith.constant 0 : index
    %316 = vector.load %arg3[%c0_26, %315, %c0_27, %c0_28] : memref<1x8x8x128xf32, #tpu.memory_space<vmem>>, vector<1x1x8x128xf32>
    %317 = vector.shape_cast %316 : vector<1x1x8x128xf32> to vector<8x128xf32>
    %cst_29 = arith.constant 0.000000e+00 : f32
    %318 = vector.broadcast %cst_29 : f32 to vector<8x128xf32>
    %319 = arith.subf %318, %317 : vector<8x128xf32>
    %320 = arith.cmpf oge, %317, %7 : vector<8x128xf32>
    %321 = arith.extui %320 : vector<8x128xi1> to vector<8x128xi32>
    %322 = arith.sitofp %321 : vector<8x128xi32> to vector<8x128xf32>
    %323 = arith.cmpf oge, %319, %7 : vector<8x128xf32>
    %324 = arith.extui %323 : vector<8x128xi1> to vector<8x128xi32>
    %325 = arith.sitofp %324 : vector<8x128xi32> to vector<8x128xf32>
    %326 = arith.addf %322, %325 : vector<8x128xf32>
    %327 = arith.addf %233, %326 : vector<8x128xf32>
    %328 = arith.subf %322, %325 : vector<8x128xf32>
    %329 = arith.mulf %317, %328 : vector<8x128xf32>
    %330 = arith.addf %236, %329 : vector<8x128xf32>
    %331 = arith.cmpf oge, %317, %9 : vector<8x128xf32>
    %332 = arith.extui %331 : vector<8x128xi1> to vector<8x128xi32>
    %333 = arith.sitofp %332 : vector<8x128xi32> to vector<8x128xf32>
    %334 = arith.cmpf oge, %319, %9 : vector<8x128xf32>
    %335 = arith.extui %334 : vector<8x128xi1> to vector<8x128xi32>
    %336 = arith.sitofp %335 : vector<8x128xi32> to vector<8x128xf32>
    %337 = arith.addf %333, %336 : vector<8x128xf32>
    %338 = arith.addf %244, %337 : vector<8x128xf32>
    %339 = arith.subf %333, %336 : vector<8x128xf32>
    %340 = arith.mulf %317, %339 : vector<8x128xf32>
    %341 = arith.addf %247, %340 : vector<8x128xf32>
    %342 = arith.cmpf oge, %317, %11 : vector<8x128xf32>
    %343 = arith.extui %342 : vector<8x128xi1> to vector<8x128xi32>
    %344 = arith.sitofp %343 : vector<8x128xi32> to vector<8x128xf32>
    %345 = arith.cmpf oge, %319, %11 : vector<8x128xf32>
    %346 = arith.extui %345 : vector<8x128xi1> to vector<8x128xi32>
    %347 = arith.sitofp %346 : vector<8x128xi32> to vector<8x128xf32>
    %348 = arith.addf %344, %347 : vector<8x128xf32>
    %349 = arith.addf %255, %348 : vector<8x128xf32>
    %350 = arith.subf %344, %347 : vector<8x128xf32>
    %351 = arith.mulf %317, %350 : vector<8x128xf32>
    %352 = arith.addf %258, %351 : vector<8x128xf32>
    %353 = arith.cmpf oge, %317, %13 : vector<8x128xf32>
    %354 = arith.extui %353 : vector<8x128xi1> to vector<8x128xi32>
    %355 = arith.sitofp %354 : vector<8x128xi32> to vector<8x128xf32>
    %356 = arith.cmpf oge, %319, %13 : vector<8x128xf32>
    %357 = arith.extui %356 : vector<8x128xi1> to vector<8x128xi32>
    %358 = arith.sitofp %357 : vector<8x128xi32> to vector<8x128xf32>
    %359 = arith.addf %355, %358 : vector<8x128xf32>
    %360 = arith.addf %266, %359 : vector<8x128xf32>
    %361 = arith.subf %355, %358 : vector<8x128xf32>
    %362 = arith.mulf %317, %361 : vector<8x128xf32>
    %363 = arith.addf %269, %362 : vector<8x128xf32>
    %364 = arith.cmpf oge, %317, %15 : vector<8x128xf32>
    %365 = arith.extui %364 : vector<8x128xi1> to vector<8x128xi32>
    %366 = arith.sitofp %365 : vector<8x128xi32> to vector<8x128xf32>
    %367 = arith.cmpf oge, %319, %15 : vector<8x128xf32>
    %368 = arith.extui %367 : vector<8x128xi1> to vector<8x128xi32>
    %369 = arith.sitofp %368 : vector<8x128xi32> to vector<8x128xf32>
    %370 = arith.addf %366, %369 : vector<8x128xf32>
    %371 = arith.addf %277, %370 : vector<8x128xf32>
    %372 = arith.subf %366, %369 : vector<8x128xf32>
    %373 = arith.mulf %317, %372 : vector<8x128xf32>
    %374 = arith.addf %280, %373 : vector<8x128xf32>
    %375 = arith.cmpf oge, %317, %17 : vector<8x128xf32>
    %376 = arith.extui %375 : vector<8x128xi1> to vector<8x128xi32>
    %377 = arith.sitofp %376 : vector<8x128xi32> to vector<8x128xf32>
    %378 = arith.cmpf oge, %319, %17 : vector<8x128xf32>
    %379 = arith.extui %378 : vector<8x128xi1> to vector<8x128xi32>
    %380 = arith.sitofp %379 : vector<8x128xi32> to vector<8x128xf32>
    %381 = arith.addf %377, %380 : vector<8x128xf32>
    %382 = arith.addf %288, %381 : vector<8x128xf32>
    %383 = arith.subf %377, %380 : vector<8x128xf32>
    %384 = arith.mulf %317, %383 : vector<8x128xf32>
    %385 = arith.addf %291, %384 : vector<8x128xf32>
    %386 = arith.cmpf oge, %317, %19 : vector<8x128xf32>
    %387 = arith.extui %386 : vector<8x128xi1> to vector<8x128xi32>
    %388 = arith.sitofp %387 : vector<8x128xi32> to vector<8x128xf32>
    %389 = arith.cmpf oge, %319, %19 : vector<8x128xf32>
    %390 = arith.extui %389 : vector<8x128xi1> to vector<8x128xi32>
    %391 = arith.sitofp %390 : vector<8x128xi32> to vector<8x128xf32>
    %392 = arith.addf %388, %391 : vector<8x128xf32>
    %393 = arith.addf %299, %392 : vector<8x128xf32>
    %394 = arith.subf %388, %391 : vector<8x128xf32>
    %395 = arith.mulf %317, %394 : vector<8x128xf32>
    %396 = arith.addf %302, %395 : vector<8x128xf32>
    %397 = arith.cmpf oge, %317, %21 : vector<8x128xf32>
    %398 = arith.extui %397 : vector<8x128xi1> to vector<8x128xi32>
    %399 = arith.sitofp %398 : vector<8x128xi32> to vector<8x128xf32>
    %400 = arith.cmpf oge, %319, %21 : vector<8x128xf32>
    %401 = arith.extui %400 : vector<8x128xi1> to vector<8x128xi32>
    %402 = arith.sitofp %401 : vector<8x128xi32> to vector<8x128xf32>
    %403 = arith.addf %399, %402 : vector<8x128xf32>
    %404 = arith.addf %310, %403 : vector<8x128xf32>
    %405 = arith.subf %399, %402 : vector<8x128xf32>
    %406 = arith.mulf %317, %405 : vector<8x128xf32>
    %407 = arith.addf %313, %406 : vector<8x128xf32>
    %c4_i32 = arith.constant 4 : i32
    %408 = arith.addi %31, %c4_i32 : i32
    %c0_30 = arith.constant 0 : index
    %409 = arith.index_cast %408 : i32 to index
    %c0_31 = arith.constant 0 : index
    %c0_32 = arith.constant 0 : index
    %410 = vector.load %arg3[%c0_30, %409, %c0_31, %c0_32] : memref<1x8x8x128xf32, #tpu.memory_space<vmem>>, vector<1x1x8x128xf32>
    %411 = vector.shape_cast %410 : vector<1x1x8x128xf32> to vector<8x128xf32>
    %cst_33 = arith.constant 0.000000e+00 : f32
    %412 = vector.broadcast %cst_33 : f32 to vector<8x128xf32>
    %413 = arith.subf %412, %411 : vector<8x128xf32>
    %414 = arith.cmpf oge, %411, %7 : vector<8x128xf32>
    %415 = arith.extui %414 : vector<8x128xi1> to vector<8x128xi32>
    %416 = arith.sitofp %415 : vector<8x128xi32> to vector<8x128xf32>
    %417 = arith.cmpf oge, %413, %7 : vector<8x128xf32>
    %418 = arith.extui %417 : vector<8x128xi1> to vector<8x128xi32>
    %419 = arith.sitofp %418 : vector<8x128xi32> to vector<8x128xf32>
    %420 = arith.addf %416, %419 : vector<8x128xf32>
    %421 = arith.addf %327, %420 : vector<8x128xf32>
    %422 = arith.subf %416, %419 : vector<8x128xf32>
    %423 = arith.mulf %411, %422 : vector<8x128xf32>
    %424 = arith.addf %330, %423 : vector<8x128xf32>
    %425 = arith.cmpf oge, %411, %9 : vector<8x128xf32>
    %426 = arith.extui %425 : vector<8x128xi1> to vector<8x128xi32>
    %427 = arith.sitofp %426 : vector<8x128xi32> to vector<8x128xf32>
    %428 = arith.cmpf oge, %413, %9 : vector<8x128xf32>
    %429 = arith.extui %428 : vector<8x128xi1> to vector<8x128xi32>
    %430 = arith.sitofp %429 : vector<8x128xi32> to vector<8x128xf32>
    %431 = arith.addf %427, %430 : vector<8x128xf32>
    %432 = arith.addf %338, %431 : vector<8x128xf32>
    %433 = arith.subf %427, %430 : vector<8x128xf32>
    %434 = arith.mulf %411, %433 : vector<8x128xf32>
    %435 = arith.addf %341, %434 : vector<8x128xf32>
    %436 = arith.cmpf oge, %411, %11 : vector<8x128xf32>
    %437 = arith.extui %436 : vector<8x128xi1> to vector<8x128xi32>
    %438 = arith.sitofp %437 : vector<8x128xi32> to vector<8x128xf32>
    %439 = arith.cmpf oge, %413, %11 : vector<8x128xf32>
    %440 = arith.extui %439 : vector<8x128xi1> to vector<8x128xi32>
    %441 = arith.sitofp %440 : vector<8x128xi32> to vector<8x128xf32>
    %442 = arith.addf %438, %441 : vector<8x128xf32>
    %443 = arith.addf %349, %442 : vector<8x128xf32>
    %444 = arith.subf %438, %441 : vector<8x128xf32>
    %445 = arith.mulf %411, %444 : vector<8x128xf32>
    %446 = arith.addf %352, %445 : vector<8x128xf32>
    %447 = arith.cmpf oge, %411, %13 : vector<8x128xf32>
    %448 = arith.extui %447 : vector<8x128xi1> to vector<8x128xi32>
    %449 = arith.sitofp %448 : vector<8x128xi32> to vector<8x128xf32>
    %450 = arith.cmpf oge, %413, %13 : vector<8x128xf32>
    %451 = arith.extui %450 : vector<8x128xi1> to vector<8x128xi32>
    %452 = arith.sitofp %451 : vector<8x128xi32> to vector<8x128xf32>
    %453 = arith.addf %449, %452 : vector<8x128xf32>
    %454 = arith.addf %360, %453 : vector<8x128xf32>
    %455 = arith.subf %449, %452 : vector<8x128xf32>
    %456 = arith.mulf %411, %455 : vector<8x128xf32>
    %457 = arith.addf %363, %456 : vector<8x128xf32>
    %458 = arith.cmpf oge, %411, %15 : vector<8x128xf32>
    %459 = arith.extui %458 : vector<8x128xi1> to vector<8x128xi32>
    %460 = arith.sitofp %459 : vector<8x128xi32> to vector<8x128xf32>
    %461 = arith.cmpf oge, %413, %15 : vector<8x128xf32>
    %462 = arith.extui %461 : vector<8x128xi1> to vector<8x128xi32>
    %463 = arith.sitofp %462 : vector<8x128xi32> to vector<8x128xf32>
    %464 = arith.addf %460, %463 : vector<8x128xf32>
    %465 = arith.addf %371, %464 : vector<8x128xf32>
    %466 = arith.subf %460, %463 : vector<8x128xf32>
    %467 = arith.mulf %411, %466 : vector<8x128xf32>
    %468 = arith.addf %374, %467 : vector<8x128xf32>
    %469 = arith.cmpf oge, %411, %17 : vector<8x128xf32>
    %470 = arith.extui %469 : vector<8x128xi1> to vector<8x128xi32>
    %471 = arith.sitofp %470 : vector<8x128xi32> to vector<8x128xf32>
    %472 = arith.cmpf oge, %413, %17 : vector<8x128xf32>
    %473 = arith.extui %472 : vector<8x128xi1> to vector<8x128xi32>
    %474 = arith.sitofp %473 : vector<8x128xi32> to vector<8x128xf32>
    %475 = arith.addf %471, %474 : vector<8x128xf32>
    %476 = arith.addf %382, %475 : vector<8x128xf32>
    %477 = arith.subf %471, %474 : vector<8x128xf32>
    %478 = arith.mulf %411, %477 : vector<8x128xf32>
    %479 = arith.addf %385, %478 : vector<8x128xf32>
    %480 = arith.cmpf oge, %411, %19 : vector<8x128xf32>
    %481 = arith.extui %480 : vector<8x128xi1> to vector<8x128xi32>
    %482 = arith.sitofp %481 : vector<8x128xi32> to vector<8x128xf32>
    %483 = arith.cmpf oge, %413, %19 : vector<8x128xf32>
    %484 = arith.extui %483 : vector<8x128xi1> to vector<8x128xi32>
    %485 = arith.sitofp %484 : vector<8x128xi32> to vector<8x128xf32>
    %486 = arith.addf %482, %485 : vector<8x128xf32>
    %487 = arith.addf %393, %486 : vector<8x128xf32>
    %488 = arith.subf %482, %485 : vector<8x128xf32>
    %489 = arith.mulf %411, %488 : vector<8x128xf32>
    %490 = arith.addf %396, %489 : vector<8x128xf32>
    %491 = arith.cmpf oge, %411, %21 : vector<8x128xf32>
    %492 = arith.extui %491 : vector<8x128xi1> to vector<8x128xi32>
    %493 = arith.sitofp %492 : vector<8x128xi32> to vector<8x128xf32>
    %494 = arith.cmpf oge, %413, %21 : vector<8x128xf32>
    %495 = arith.extui %494 : vector<8x128xi1> to vector<8x128xi32>
    %496 = arith.sitofp %495 : vector<8x128xi32> to vector<8x128xf32>
    %497 = arith.addf %493, %496 : vector<8x128xf32>
    %498 = arith.addf %404, %497 : vector<8x128xf32>
    %499 = arith.subf %493, %496 : vector<8x128xf32>
    %500 = arith.mulf %411, %499 : vector<8x128xf32>
    %501 = arith.addf %407, %500 : vector<8x128xf32>
    %c5_i32 = arith.constant 5 : i32
    %502 = arith.addi %31, %c5_i32 : i32
    %c0_34 = arith.constant 0 : index
    %503 = arith.index_cast %502 : i32 to index
    %c0_35 = arith.constant 0 : index
    %c0_36 = arith.constant 0 : index
    %504 = vector.load %arg3[%c0_34, %503, %c0_35, %c0_36] : memref<1x8x8x128xf32, #tpu.memory_space<vmem>>, vector<1x1x8x128xf32>
    %505 = vector.shape_cast %504 : vector<1x1x8x128xf32> to vector<8x128xf32>
    %cst_37 = arith.constant 0.000000e+00 : f32
    %506 = vector.broadcast %cst_37 : f32 to vector<8x128xf32>
    %507 = arith.subf %506, %505 : vector<8x128xf32>
    %508 = arith.cmpf oge, %505, %7 : vector<8x128xf32>
    %509 = arith.extui %508 : vector<8x128xi1> to vector<8x128xi32>
    %510 = arith.sitofp %509 : vector<8x128xi32> to vector<8x128xf32>
    %511 = arith.cmpf oge, %507, %7 : vector<8x128xf32>
    %512 = arith.extui %511 : vector<8x128xi1> to vector<8x128xi32>
    %513 = arith.sitofp %512 : vector<8x128xi32> to vector<8x128xf32>
    %514 = arith.addf %510, %513 : vector<8x128xf32>
    %515 = arith.addf %421, %514 : vector<8x128xf32>
    %516 = arith.subf %510, %513 : vector<8x128xf32>
    %517 = arith.mulf %505, %516 : vector<8x128xf32>
    %518 = arith.addf %424, %517 : vector<8x128xf32>
    %519 = arith.cmpf oge, %505, %9 : vector<8x128xf32>
    %520 = arith.extui %519 : vector<8x128xi1> to vector<8x128xi32>
    %521 = arith.sitofp %520 : vector<8x128xi32> to vector<8x128xf32>
    %522 = arith.cmpf oge, %507, %9 : vector<8x128xf32>
    %523 = arith.extui %522 : vector<8x128xi1> to vector<8x128xi32>
    %524 = arith.sitofp %523 : vector<8x128xi32> to vector<8x128xf32>
    %525 = arith.addf %521, %524 : vector<8x128xf32>
    %526 = arith.addf %432, %525 : vector<8x128xf32>
    %527 = arith.subf %521, %524 : vector<8x128xf32>
    %528 = arith.mulf %505, %527 : vector<8x128xf32>
    %529 = arith.addf %435, %528 : vector<8x128xf32>
    %530 = arith.cmpf oge, %505, %11 : vector<8x128xf32>
    %531 = arith.extui %530 : vector<8x128xi1> to vector<8x128xi32>
    %532 = arith.sitofp %531 : vector<8x128xi32> to vector<8x128xf32>
    %533 = arith.cmpf oge, %507, %11 : vector<8x128xf32>
    %534 = arith.extui %533 : vector<8x128xi1> to vector<8x128xi32>
    %535 = arith.sitofp %534 : vector<8x128xi32> to vector<8x128xf32>
    %536 = arith.addf %532, %535 : vector<8x128xf32>
    %537 = arith.addf %443, %536 : vector<8x128xf32>
    %538 = arith.subf %532, %535 : vector<8x128xf32>
    %539 = arith.mulf %505, %538 : vector<8x128xf32>
    %540 = arith.addf %446, %539 : vector<8x128xf32>
    %541 = arith.cmpf oge, %505, %13 : vector<8x128xf32>
    %542 = arith.extui %541 : vector<8x128xi1> to vector<8x128xi32>
    %543 = arith.sitofp %542 : vector<8x128xi32> to vector<8x128xf32>
    %544 = arith.cmpf oge, %507, %13 : vector<8x128xf32>
    %545 = arith.extui %544 : vector<8x128xi1> to vector<8x128xi32>
    %546 = arith.sitofp %545 : vector<8x128xi32> to vector<8x128xf32>
    %547 = arith.addf %543, %546 : vector<8x128xf32>
    %548 = arith.addf %454, %547 : vector<8x128xf32>
    %549 = arith.subf %543, %546 : vector<8x128xf32>
    %550 = arith.mulf %505, %549 : vector<8x128xf32>
    %551 = arith.addf %457, %550 : vector<8x128xf32>
    %552 = arith.cmpf oge, %505, %15 : vector<8x128xf32>
    %553 = arith.extui %552 : vector<8x128xi1> to vector<8x128xi32>
    %554 = arith.sitofp %553 : vector<8x128xi32> to vector<8x128xf32>
    %555 = arith.cmpf oge, %507, %15 : vector<8x128xf32>
    %556 = arith.extui %555 : vector<8x128xi1> to vector<8x128xi32>
    %557 = arith.sitofp %556 : vector<8x128xi32> to vector<8x128xf32>
    %558 = arith.addf %554, %557 : vector<8x128xf32>
    %559 = arith.addf %465, %558 : vector<8x128xf32>
    %560 = arith.subf %554, %557 : vector<8x128xf32>
    %561 = arith.mulf %505, %560 : vector<8x128xf32>
    %562 = arith.addf %468, %561 : vector<8x128xf32>
    %563 = arith.cmpf oge, %505, %17 : vector<8x128xf32>
    %564 = arith.extui %563 : vector<8x128xi1> to vector<8x128xi32>
    %565 = arith.sitofp %564 : vector<8x128xi32> to vector<8x128xf32>
    %566 = arith.cmpf oge, %507, %17 : vector<8x128xf32>
    %567 = arith.extui %566 : vector<8x128xi1> to vector<8x128xi32>
    %568 = arith.sitofp %567 : vector<8x128xi32> to vector<8x128xf32>
    %569 = arith.addf %565, %568 : vector<8x128xf32>
    %570 = arith.addf %476, %569 : vector<8x128xf32>
    %571 = arith.subf %565, %568 : vector<8x128xf32>
    %572 = arith.mulf %505, %571 : vector<8x128xf32>
    %573 = arith.addf %479, %572 : vector<8x128xf32>
    %574 = arith.cmpf oge, %505, %19 : vector<8x128xf32>
    %575 = arith.extui %574 : vector<8x128xi1> to vector<8x128xi32>
    %576 = arith.sitofp %575 : vector<8x128xi32> to vector<8x128xf32>
    %577 = arith.cmpf oge, %507, %19 : vector<8x128xf32>
    %578 = arith.extui %577 : vector<8x128xi1> to vector<8x128xi32>
    %579 = arith.sitofp %578 : vector<8x128xi32> to vector<8x128xf32>
    %580 = arith.addf %576, %579 : vector<8x128xf32>
    %581 = arith.addf %487, %580 : vector<8x128xf32>
    %582 = arith.subf %576, %579 : vector<8x128xf32>
    %583 = arith.mulf %505, %582 : vector<8x128xf32>
    %584 = arith.addf %490, %583 : vector<8x128xf32>
    %585 = arith.cmpf oge, %505, %21 : vector<8x128xf32>
    %586 = arith.extui %585 : vector<8x128xi1> to vector<8x128xi32>
    %587 = arith.sitofp %586 : vector<8x128xi32> to vector<8x128xf32>
    %588 = arith.cmpf oge, %507, %21 : vector<8x128xf32>
    %589 = arith.extui %588 : vector<8x128xi1> to vector<8x128xi32>
    %590 = arith.sitofp %589 : vector<8x128xi32> to vector<8x128xf32>
    %591 = arith.addf %587, %590 : vector<8x128xf32>
    %592 = arith.addf %498, %591 : vector<8x128xf32>
    %593 = arith.subf %587, %590 : vector<8x128xf32>
    %594 = arith.mulf %505, %593 : vector<8x128xf32>
    %595 = arith.addf %501, %594 : vector<8x128xf32>
    %c6_i32 = arith.constant 6 : i32
    %596 = arith.addi %31, %c6_i32 : i32
    %c0_38 = arith.constant 0 : index
    %597 = arith.index_cast %596 : i32 to index
    %c0_39 = arith.constant 0 : index
    %c0_40 = arith.constant 0 : index
    %598 = vector.load %arg3[%c0_38, %597, %c0_39, %c0_40] : memref<1x8x8x128xf32, #tpu.memory_space<vmem>>, vector<1x1x8x128xf32>
    %599 = vector.shape_cast %598 : vector<1x1x8x128xf32> to vector<8x128xf32>
    %cst_41 = arith.constant 0.000000e+00 : f32
    %600 = vector.broadcast %cst_41 : f32 to vector<8x128xf32>
    %601 = arith.subf %600, %599 : vector<8x128xf32>
    %602 = arith.cmpf oge, %599, %7 : vector<8x128xf32>
    %603 = arith.extui %602 : vector<8x128xi1> to vector<8x128xi32>
    %604 = arith.sitofp %603 : vector<8x128xi32> to vector<8x128xf32>
    %605 = arith.cmpf oge, %601, %7 : vector<8x128xf32>
    %606 = arith.extui %605 : vector<8x128xi1> to vector<8x128xi32>
    %607 = arith.sitofp %606 : vector<8x128xi32> to vector<8x128xf32>
    %608 = arith.addf %604, %607 : vector<8x128xf32>
    %609 = arith.addf %515, %608 : vector<8x128xf32>
    %610 = arith.subf %604, %607 : vector<8x128xf32>
    %611 = arith.mulf %599, %610 : vector<8x128xf32>
    %612 = arith.addf %518, %611 : vector<8x128xf32>
    %613 = arith.cmpf oge, %599, %9 : vector<8x128xf32>
    %614 = arith.extui %613 : vector<8x128xi1> to vector<8x128xi32>
    %615 = arith.sitofp %614 : vector<8x128xi32> to vector<8x128xf32>
    %616 = arith.cmpf oge, %601, %9 : vector<8x128xf32>
    %617 = arith.extui %616 : vector<8x128xi1> to vector<8x128xi32>
    %618 = arith.sitofp %617 : vector<8x128xi32> to vector<8x128xf32>
    %619 = arith.addf %615, %618 : vector<8x128xf32>
    %620 = arith.addf %526, %619 : vector<8x128xf32>
    %621 = arith.subf %615, %618 : vector<8x128xf32>
    %622 = arith.mulf %599, %621 : vector<8x128xf32>
    %623 = arith.addf %529, %622 : vector<8x128xf32>
    %624 = arith.cmpf oge, %599, %11 : vector<8x128xf32>
    %625 = arith.extui %624 : vector<8x128xi1> to vector<8x128xi32>
    %626 = arith.sitofp %625 : vector<8x128xi32> to vector<8x128xf32>
    %627 = arith.cmpf oge, %601, %11 : vector<8x128xf32>
    %628 = arith.extui %627 : vector<8x128xi1> to vector<8x128xi32>
    %629 = arith.sitofp %628 : vector<8x128xi32> to vector<8x128xf32>
    %630 = arith.addf %626, %629 : vector<8x128xf32>
    %631 = arith.addf %537, %630 : vector<8x128xf32>
    %632 = arith.subf %626, %629 : vector<8x128xf32>
    %633 = arith.mulf %599, %632 : vector<8x128xf32>
    %634 = arith.addf %540, %633 : vector<8x128xf32>
    %635 = arith.cmpf oge, %599, %13 : vector<8x128xf32>
    %636 = arith.extui %635 : vector<8x128xi1> to vector<8x128xi32>
    %637 = arith.sitofp %636 : vector<8x128xi32> to vector<8x128xf32>
    %638 = arith.cmpf oge, %601, %13 : vector<8x128xf32>
    %639 = arith.extui %638 : vector<8x128xi1> to vector<8x128xi32>
    %640 = arith.sitofp %639 : vector<8x128xi32> to vector<8x128xf32>
    %641 = arith.addf %637, %640 : vector<8x128xf32>
    %642 = arith.addf %548, %641 : vector<8x128xf32>
    %643 = arith.subf %637, %640 : vector<8x128xf32>
    %644 = arith.mulf %599, %643 : vector<8x128xf32>
    %645 = arith.addf %551, %644 : vector<8x128xf32>
    %646 = arith.cmpf oge, %599, %15 : vector<8x128xf32>
    %647 = arith.extui %646 : vector<8x128xi1> to vector<8x128xi32>
    %648 = arith.sitofp %647 : vector<8x128xi32> to vector<8x128xf32>
    %649 = arith.cmpf oge, %601, %15 : vector<8x128xf32>
    %650 = arith.extui %649 : vector<8x128xi1> to vector<8x128xi32>
    %651 = arith.sitofp %650 : vector<8x128xi32> to vector<8x128xf32>
    %652 = arith.addf %648, %651 : vector<8x128xf32>
    %653 = arith.addf %559, %652 : vector<8x128xf32>
    %654 = arith.subf %648, %651 : vector<8x128xf32>
    %655 = arith.mulf %599, %654 : vector<8x128xf32>
    %656 = arith.addf %562, %655 : vector<8x128xf32>
    %657 = arith.cmpf oge, %599, %17 : vector<8x128xf32>
    %658 = arith.extui %657 : vector<8x128xi1> to vector<8x128xi32>
    %659 = arith.sitofp %658 : vector<8x128xi32> to vector<8x128xf32>
    %660 = arith.cmpf oge, %601, %17 : vector<8x128xf32>
    %661 = arith.extui %660 : vector<8x128xi1> to vector<8x128xi32>
    %662 = arith.sitofp %661 : vector<8x128xi32> to vector<8x128xf32>
    %663 = arith.addf %659, %662 : vector<8x128xf32>
    %664 = arith.addf %570, %663 : vector<8x128xf32>
    %665 = arith.subf %659, %662 : vector<8x128xf32>
    %666 = arith.mulf %599, %665 : vector<8x128xf32>
    %667 = arith.addf %573, %666 : vector<8x128xf32>
    %668 = arith.cmpf oge, %599, %19 : vector<8x128xf32>
    %669 = arith.extui %668 : vector<8x128xi1> to vector<8x128xi32>
    %670 = arith.sitofp %669 : vector<8x128xi32> to vector<8x128xf32>
    %671 = arith.cmpf oge, %601, %19 : vector<8x128xf32>
    %672 = arith.extui %671 : vector<8x128xi1> to vector<8x128xi32>
    %673 = arith.sitofp %672 : vector<8x128xi32> to vector<8x128xf32>
    %674 = arith.addf %670, %673 : vector<8x128xf32>
    %675 = arith.addf %581, %674 : vector<8x128xf32>
    %676 = arith.subf %670, %673 : vector<8x128xf32>
    %677 = arith.mulf %599, %676 : vector<8x128xf32>
    %678 = arith.addf %584, %677 : vector<8x128xf32>
    %679 = arith.cmpf oge, %599, %21 : vector<8x128xf32>
    %680 = arith.extui %679 : vector<8x128xi1> to vector<8x128xi32>
    %681 = arith.sitofp %680 : vector<8x128xi32> to vector<8x128xf32>
    %682 = arith.cmpf oge, %601, %21 : vector<8x128xf32>
    %683 = arith.extui %682 : vector<8x128xi1> to vector<8x128xi32>
    %684 = arith.sitofp %683 : vector<8x128xi32> to vector<8x128xf32>
    %685 = arith.addf %681, %684 : vector<8x128xf32>
    %686 = arith.addf %592, %685 : vector<8x128xf32>
    %687 = arith.subf %681, %684 : vector<8x128xf32>
    %688 = arith.mulf %599, %687 : vector<8x128xf32>
    %689 = arith.addf %595, %688 : vector<8x128xf32>
    %c7_i32 = arith.constant 7 : i32
    %690 = arith.addi %31, %c7_i32 : i32
    %c0_42 = arith.constant 0 : index
    %691 = arith.index_cast %690 : i32 to index
    %c0_43 = arith.constant 0 : index
    %c0_44 = arith.constant 0 : index
    %692 = vector.load %arg3[%c0_42, %691, %c0_43, %c0_44] : memref<1x8x8x128xf32, #tpu.memory_space<vmem>>, vector<1x1x8x128xf32>
    %693 = vector.shape_cast %692 : vector<1x1x8x128xf32> to vector<8x128xf32>
    %cst_45 = arith.constant 0.000000e+00 : f32
    %694 = vector.broadcast %cst_45 : f32 to vector<8x128xf32>
    %695 = arith.subf %694, %693 : vector<8x128xf32>
    %696 = arith.cmpf oge, %693, %7 : vector<8x128xf32>
    %697 = arith.extui %696 : vector<8x128xi1> to vector<8x128xi32>
    %698 = arith.sitofp %697 : vector<8x128xi32> to vector<8x128xf32>
    %699 = arith.cmpf oge, %695, %7 : vector<8x128xf32>
    %700 = arith.extui %699 : vector<8x128xi1> to vector<8x128xi32>
    %701 = arith.sitofp %700 : vector<8x128xi32> to vector<8x128xf32>
    %702 = arith.addf %698, %701 : vector<8x128xf32>
    %703 = arith.addf %609, %702 : vector<8x128xf32>
    %704 = arith.subf %698, %701 : vector<8x128xf32>
    %705 = arith.mulf %693, %704 : vector<8x128xf32>
    %706 = arith.addf %612, %705 : vector<8x128xf32>
    %707 = arith.cmpf oge, %693, %9 : vector<8x128xf32>
    %708 = arith.extui %707 : vector<8x128xi1> to vector<8x128xi32>
    %709 = arith.sitofp %708 : vector<8x128xi32> to vector<8x128xf32>
    %710 = arith.cmpf oge, %695, %9 : vector<8x128xf32>
    %711 = arith.extui %710 : vector<8x128xi1> to vector<8x128xi32>
    %712 = arith.sitofp %711 : vector<8x128xi32> to vector<8x128xf32>
    %713 = arith.addf %709, %712 : vector<8x128xf32>
    %714 = arith.addf %620, %713 : vector<8x128xf32>
    %715 = arith.subf %709, %712 : vector<8x128xf32>
    %716 = arith.mulf %693, %715 : vector<8x128xf32>
    %717 = arith.addf %623, %716 : vector<8x128xf32>
    %718 = arith.cmpf oge, %693, %11 : vector<8x128xf32>
    %719 = arith.extui %718 : vector<8x128xi1> to vector<8x128xi32>
    %720 = arith.sitofp %719 : vector<8x128xi32> to vector<8x128xf32>
    %721 = arith.cmpf oge, %695, %11 : vector<8x128xf32>
    %722 = arith.extui %721 : vector<8x128xi1> to vector<8x128xi32>
    %723 = arith.sitofp %722 : vector<8x128xi32> to vector<8x128xf32>
    %724 = arith.addf %720, %723 : vector<8x128xf32>
    %725 = arith.addf %631, %724 : vector<8x128xf32>
    %726 = arith.subf %720, %723 : vector<8x128xf32>
    %727 = arith.mulf %693, %726 : vector<8x128xf32>
    %728 = arith.addf %634, %727 : vector<8x128xf32>
    %729 = arith.cmpf oge, %693, %13 : vector<8x128xf32>
    %730 = arith.extui %729 : vector<8x128xi1> to vector<8x128xi32>
    %731 = arith.sitofp %730 : vector<8x128xi32> to vector<8x128xf32>
    %732 = arith.cmpf oge, %695, %13 : vector<8x128xf32>
    %733 = arith.extui %732 : vector<8x128xi1> to vector<8x128xi32>
    %734 = arith.sitofp %733 : vector<8x128xi32> to vector<8x128xf32>
    %735 = arith.addf %731, %734 : vector<8x128xf32>
    %736 = arith.addf %642, %735 : vector<8x128xf32>
    %737 = arith.subf %731, %734 : vector<8x128xf32>
    %738 = arith.mulf %693, %737 : vector<8x128xf32>
    %739 = arith.addf %645, %738 : vector<8x128xf32>
    %740 = arith.cmpf oge, %693, %15 : vector<8x128xf32>
    %741 = arith.extui %740 : vector<8x128xi1> to vector<8x128xi32>
    %742 = arith.sitofp %741 : vector<8x128xi32> to vector<8x128xf32>
    %743 = arith.cmpf oge, %695, %15 : vector<8x128xf32>
    %744 = arith.extui %743 : vector<8x128xi1> to vector<8x128xi32>
    %745 = arith.sitofp %744 : vector<8x128xi32> to vector<8x128xf32>
    %746 = arith.addf %742, %745 : vector<8x128xf32>
    %747 = arith.addf %653, %746 : vector<8x128xf32>
    %748 = arith.subf %742, %745 : vector<8x128xf32>
    %749 = arith.mulf %693, %748 : vector<8x128xf32>
    %750 = arith.addf %656, %749 : vector<8x128xf32>
    %751 = arith.cmpf oge, %693, %17 : vector<8x128xf32>
    %752 = arith.extui %751 : vector<8x128xi1> to vector<8x128xi32>
    %753 = arith.sitofp %752 : vector<8x128xi32> to vector<8x128xf32>
    %754 = arith.cmpf oge, %695, %17 : vector<8x128xf32>
    %755 = arith.extui %754 : vector<8x128xi1> to vector<8x128xi32>
    %756 = arith.sitofp %755 : vector<8x128xi32> to vector<8x128xf32>
    %757 = arith.addf %753, %756 : vector<8x128xf32>
    %758 = arith.addf %664, %757 : vector<8x128xf32>
    %759 = arith.subf %753, %756 : vector<8x128xf32>
    %760 = arith.mulf %693, %759 : vector<8x128xf32>
    %761 = arith.addf %667, %760 : vector<8x128xf32>
    %762 = arith.cmpf oge, %693, %19 : vector<8x128xf32>
    %763 = arith.extui %762 : vector<8x128xi1> to vector<8x128xi32>
    %764 = arith.sitofp %763 : vector<8x128xi32> to vector<8x128xf32>
    %765 = arith.cmpf oge, %695, %19 : vector<8x128xf32>
    %766 = arith.extui %765 : vector<8x128xi1> to vector<8x128xi32>
    %767 = arith.sitofp %766 : vector<8x128xi32> to vector<8x128xf32>
    %768 = arith.addf %764, %767 : vector<8x128xf32>
    %769 = arith.addf %675, %768 : vector<8x128xf32>
    %770 = arith.subf %764, %767 : vector<8x128xf32>
    %771 = arith.mulf %693, %770 : vector<8x128xf32>
    %772 = arith.addf %678, %771 : vector<8x128xf32>
    %773 = arith.cmpf oge, %693, %21 : vector<8x128xf32>
    %774 = arith.extui %773 : vector<8x128xi1> to vector<8x128xi32>
    %775 = arith.sitofp %774 : vector<8x128xi32> to vector<8x128xf32>
    %776 = arith.cmpf oge, %695, %21 : vector<8x128xf32>
    %777 = arith.extui %776 : vector<8x128xi1> to vector<8x128xi32>
    %778 = arith.sitofp %777 : vector<8x128xi32> to vector<8x128xf32>
    %779 = arith.addf %775, %778 : vector<8x128xf32>
    %780 = arith.addf %686, %779 : vector<8x128xf32>
    %781 = arith.subf %775, %778 : vector<8x128xf32>
    %782 = arith.mulf %693, %781 : vector<8x128xf32>
    %783 = arith.addf %689, %782 : vector<8x128xf32>
    %c1_i32_46 = arith.constant 1 : i32
    %cst_47 = arith.constant 0.000000e+00 : f32
    %784 = vector.broadcast %cst_47 : f32 to vector<8x128xf32>
    %785 = arith.cmpf ole, %7, %784 : vector<8x128xf32>
    %786 = arith.extui %785 : vector<8x128xi1> to vector<8x128xi32>
    %787 = arith.sitofp %786 : vector<8x128xi32> to vector<8x128xf32>
    %cst_48 = arith.constant 2.000000e+00 : f32
    %788 = vector.broadcast %cst_48 : f32 to vector<8x128xf32>
    %789 = arith.mulf %788, %787 : vector<8x128xf32>
    %790 = arith.subf %703, %789 : vector<8x128xf32>
    %791 = arith.mulf %790, %7 : vector<8x128xf32>
    %792 = arith.subf %791, %706 : vector<8x128xf32>
    %cst_49 = arith.constant 1.000000e+00 : f32
    %793 = vector.broadcast %cst_49 : f32 to vector<8x128xf32>
    %794 = arith.addf %792, %793 : vector<8x128xf32>
    %cst_50 = arith.constant 0.000000e+00 : f32
    %795 = vector.broadcast %cst_50 : f32 to vector<8x128xf32>
    %796 = arith.cmpf oge, %794, %795 : vector<8x128xf32>
    %cst_51 = arith.constant -1.000000e+29 : f32
    %797 = vector.broadcast %cst_51 : f32 to vector<8x128xf32>
    %798 = arith.cmpf ogt, %7, %797 : vector<8x128xf32>
    %799 = arith.andi %796, %798 : vector<8x128xi1>
    %cst_52 = arith.constant 1.000000e+00 : f32
    %800 = vector.broadcast %cst_52 : f32 to vector<8x128xf32>
    %801 = arith.subf %706, %800 : vector<8x128xf32>
    %802 = arith.divf %801, %790 : vector<8x128xf32>
    %cst_53 = arith.constant 0.000000e+00 : f32
    %803 = vector.broadcast %cst_53 : f32 to vector<8x128xf32>
    %804 = arith.select %799, %790, %803 : vector<8x128xi1>, vector<8x128xf32>
    %805 = arith.cmpf ogt, %804, %0 : vector<8x128xf32>
    %806 = arith.select %805, %802, %0 : vector<8x128xi1>, vector<8x128xf32>
    %807 = arith.select %805, %804, %0 : vector<8x128xi1>, vector<8x128xf32>
    %cst_54 = arith.constant 0.000000e+00 : f32
    %808 = vector.broadcast %cst_54 : f32 to vector<8x128xf32>
    %809 = arith.cmpf ole, %9, %808 : vector<8x128xf32>
    %810 = arith.extui %809 : vector<8x128xi1> to vector<8x128xi32>
    %811 = arith.sitofp %810 : vector<8x128xi32> to vector<8x128xf32>
    %cst_55 = arith.constant 2.000000e+00 : f32
    %812 = vector.broadcast %cst_55 : f32 to vector<8x128xf32>
    %813 = arith.mulf %812, %811 : vector<8x128xf32>
    %814 = arith.subf %714, %813 : vector<8x128xf32>
    %815 = arith.mulf %814, %9 : vector<8x128xf32>
    %816 = arith.subf %815, %717 : vector<8x128xf32>
    %cst_56 = arith.constant 1.000000e+00 : f32
    %817 = vector.broadcast %cst_56 : f32 to vector<8x128xf32>
    %818 = arith.addf %816, %817 : vector<8x128xf32>
    %cst_57 = arith.constant 0.000000e+00 : f32
    %819 = vector.broadcast %cst_57 : f32 to vector<8x128xf32>
    %820 = arith.cmpf oge, %818, %819 : vector<8x128xf32>
    %cst_58 = arith.constant -1.000000e+29 : f32
    %821 = vector.broadcast %cst_58 : f32 to vector<8x128xf32>
    %822 = arith.cmpf ogt, %9, %821 : vector<8x128xf32>
    %823 = arith.andi %820, %822 : vector<8x128xi1>
    %cst_59 = arith.constant 1.000000e+00 : f32
    %824 = vector.broadcast %cst_59 : f32 to vector<8x128xf32>
    %825 = arith.subf %717, %824 : vector<8x128xf32>
    %826 = arith.divf %825, %814 : vector<8x128xf32>
    %cst_60 = arith.constant 0.000000e+00 : f32
    %827 = vector.broadcast %cst_60 : f32 to vector<8x128xf32>
    %828 = arith.select %823, %814, %827 : vector<8x128xi1>, vector<8x128xf32>
    %829 = arith.cmpf ogt, %828, %807 : vector<8x128xf32>
    %830 = arith.select %829, %826, %806 : vector<8x128xi1>, vector<8x128xf32>
    %831 = arith.select %829, %828, %807 : vector<8x128xi1>, vector<8x128xf32>
    %cst_61 = arith.constant 0.000000e+00 : f32
    %832 = vector.broadcast %cst_61 : f32 to vector<8x128xf32>
    %833 = arith.cmpf ole, %11, %832 : vector<8x128xf32>
    %834 = arith.extui %833 : vector<8x128xi1> to vector<8x128xi32>
    %835 = arith.sitofp %834 : vector<8x128xi32> to vector<8x128xf32>
    %cst_62 = arith.constant 2.000000e+00 : f32
    %836 = vector.broadcast %cst_62 : f32 to vector<8x128xf32>
    %837 = arith.mulf %836, %835 : vector<8x128xf32>
    %838 = arith.subf %725, %837 : vector<8x128xf32>
    %839 = arith.mulf %838, %11 : vector<8x128xf32>
    %840 = arith.subf %839, %728 : vector<8x128xf32>
    %cst_63 = arith.constant 1.000000e+00 : f32
    %841 = vector.broadcast %cst_63 : f32 to vector<8x128xf32>
    %842 = arith.addf %840, %841 : vector<8x128xf32>
    %cst_64 = arith.constant 0.000000e+00 : f32
    %843 = vector.broadcast %cst_64 : f32 to vector<8x128xf32>
    %844 = arith.cmpf oge, %842, %843 : vector<8x128xf32>
    %cst_65 = arith.constant -1.000000e+29 : f32
    %845 = vector.broadcast %cst_65 : f32 to vector<8x128xf32>
    %846 = arith.cmpf ogt, %11, %845 : vector<8x128xf32>
    %847 = arith.andi %844, %846 : vector<8x128xi1>
    %cst_66 = arith.constant 1.000000e+00 : f32
    %848 = vector.broadcast %cst_66 : f32 to vector<8x128xf32>
    %849 = arith.subf %728, %848 : vector<8x128xf32>
    %850 = arith.divf %849, %838 : vector<8x128xf32>
    %cst_67 = arith.constant 0.000000e+00 : f32
    %851 = vector.broadcast %cst_67 : f32 to vector<8x128xf32>
    %852 = arith.select %847, %838, %851 : vector<8x128xi1>, vector<8x128xf32>
    %853 = arith.cmpf ogt, %852, %831 : vector<8x128xf32>
    %854 = arith.select %853, %850, %830 : vector<8x128xi1>, vector<8x128xf32>
    %855 = arith.select %853, %852, %831 : vector<8x128xi1>, vector<8x128xf32>
    %cst_68 = arith.constant 0.000000e+00 : f32
    %856 = vector.broadcast %cst_68 : f32 to vector<8x128xf32>
    %857 = arith.cmpf ole, %13, %856 : vector<8x128xf32>
    %858 = arith.extui %857 : vector<8x128xi1> to vector<8x128xi32>
    %859 = arith.sitofp %858 : vector<8x128xi32> to vector<8x128xf32>
    %cst_69 = arith.constant 2.000000e+00 : f32
    %860 = vector.broadcast %cst_69 : f32 to vector<8x128xf32>
    %861 = arith.mulf %860, %859 : vector<8x128xf32>
    %862 = arith.subf %736, %861 : vector<8x128xf32>
    %863 = arith.mulf %862, %13 : vector<8x128xf32>
    %864 = arith.subf %863, %739 : vector<8x128xf32>
    %cst_70 = arith.constant 1.000000e+00 : f32
    %865 = vector.broadcast %cst_70 : f32 to vector<8x128xf32>
    %866 = arith.addf %864, %865 : vector<8x128xf32>
    %cst_71 = arith.constant 0.000000e+00 : f32
    %867 = vector.broadcast %cst_71 : f32 to vector<8x128xf32>
    %868 = arith.cmpf oge, %866, %867 : vector<8x128xf32>
    %cst_72 = arith.constant -1.000000e+29 : f32
    %869 = vector.broadcast %cst_72 : f32 to vector<8x128xf32>
    %870 = arith.cmpf ogt, %13, %869 : vector<8x128xf32>
    %871 = arith.andi %868, %870 : vector<8x128xi1>
    %cst_73 = arith.constant 1.000000e+00 : f32
    %872 = vector.broadcast %cst_73 : f32 to vector<8x128xf32>
    %873 = arith.subf %739, %872 : vector<8x128xf32>
    %874 = arith.divf %873, %862 : vector<8x128xf32>
    %cst_74 = arith.constant 0.000000e+00 : f32
    %875 = vector.broadcast %cst_74 : f32 to vector<8x128xf32>
    %876 = arith.select %871, %862, %875 : vector<8x128xi1>, vector<8x128xf32>
    %877 = arith.cmpf ogt, %876, %855 : vector<8x128xf32>
    %878 = arith.select %877, %874, %854 : vector<8x128xi1>, vector<8x128xf32>
    %879 = arith.select %877, %876, %855 : vector<8x128xi1>, vector<8x128xf32>
    %cst_75 = arith.constant 0.000000e+00 : f32
    %880 = vector.broadcast %cst_75 : f32 to vector<8x128xf32>
    %881 = arith.cmpf ole, %15, %880 : vector<8x128xf32>
    %882 = arith.extui %881 : vector<8x128xi1> to vector<8x128xi32>
    %883 = arith.sitofp %882 : vector<8x128xi32> to vector<8x128xf32>
    %cst_76 = arith.constant 2.000000e+00 : f32
    %884 = vector.broadcast %cst_76 : f32 to vector<8x128xf32>
    %885 = arith.mulf %884, %883 : vector<8x128xf32>
    %886 = arith.subf %747, %885 : vector<8x128xf32>
    %887 = arith.mulf %886, %15 : vector<8x128xf32>
    %888 = arith.subf %887, %750 : vector<8x128xf32>
    %cst_77 = arith.constant 1.000000e+00 : f32
    %889 = vector.broadcast %cst_77 : f32 to vector<8x128xf32>
    %890 = arith.addf %888, %889 : vector<8x128xf32>
    %cst_78 = arith.constant 0.000000e+00 : f32
    %891 = vector.broadcast %cst_78 : f32 to vector<8x128xf32>
    %892 = arith.cmpf oge, %890, %891 : vector<8x128xf32>
    %cst_79 = arith.constant -1.000000e+29 : f32
    %893 = vector.broadcast %cst_79 : f32 to vector<8x128xf32>
    %894 = arith.cmpf ogt, %15, %893 : vector<8x128xf32>
    %895 = arith.andi %892, %894 : vector<8x128xi1>
    %cst_80 = arith.constant 1.000000e+00 : f32
    %896 = vector.broadcast %cst_80 : f32 to vector<8x128xf32>
    %897 = arith.subf %750, %896 : vector<8x128xf32>
    %898 = arith.divf %897, %886 : vector<8x128xf32>
    %cst_81 = arith.constant 0.000000e+00 : f32
    %899 = vector.broadcast %cst_81 : f32 to vector<8x128xf32>
    %900 = arith.select %895, %886, %899 : vector<8x128xi1>, vector<8x128xf32>
    %901 = arith.cmpf ogt, %900, %879 : vector<8x128xf32>
    %902 = arith.select %901, %898, %878 : vector<8x128xi1>, vector<8x128xf32>
    %903 = arith.select %901, %900, %879 : vector<8x128xi1>, vector<8x128xf32>
    %cst_82 = arith.constant 0.000000e+00 : f32
    %904 = vector.broadcast %cst_82 : f32 to vector<8x128xf32>
    %905 = arith.cmpf ole, %17, %904 : vector<8x128xf32>
    %906 = arith.extui %905 : vector<8x128xi1> to vector<8x128xi32>
    %907 = arith.sitofp %906 : vector<8x128xi32> to vector<8x128xf32>
    %cst_83 = arith.constant 2.000000e+00 : f32
    %908 = vector.broadcast %cst_83 : f32 to vector<8x128xf32>
    %909 = arith.mulf %908, %907 : vector<8x128xf32>
    %910 = arith.subf %758, %909 : vector<8x128xf32>
    %911 = arith.mulf %910, %17 : vector<8x128xf32>
    %912 = arith.subf %911, %761 : vector<8x128xf32>
    %cst_84 = arith.constant 1.000000e+00 : f32
    %913 = vector.broadcast %cst_84 : f32 to vector<8x128xf32>
    %914 = arith.addf %912, %913 : vector<8x128xf32>
    %cst_85 = arith.constant 0.000000e+00 : f32
    %915 = vector.broadcast %cst_85 : f32 to vector<8x128xf32>
    %916 = arith.cmpf oge, %914, %915 : vector<8x128xf32>
    %cst_86 = arith.constant -1.000000e+29 : f32
    %917 = vector.broadcast %cst_86 : f32 to vector<8x128xf32>
    %918 = arith.cmpf ogt, %17, %917 : vector<8x128xf32>
    %919 = arith.andi %916, %918 : vector<8x128xi1>
    %cst_87 = arith.constant 1.000000e+00 : f32
    %920 = vector.broadcast %cst_87 : f32 to vector<8x128xf32>
    %921 = arith.subf %761, %920 : vector<8x128xf32>
    %922 = arith.divf %921, %910 : vector<8x128xf32>
    %cst_88 = arith.constant 0.000000e+00 : f32
    %923 = vector.broadcast %cst_88 : f32 to vector<8x128xf32>
    %924 = arith.select %919, %910, %923 : vector<8x128xi1>, vector<8x128xf32>
    %925 = arith.cmpf ogt, %924, %903 : vector<8x128xf32>
    %926 = arith.select %925, %922, %902 : vector<8x128xi1>, vector<8x128xf32>
    %927 = arith.select %925, %924, %903 : vector<8x128xi1>, vector<8x128xf32>
    %cst_89 = arith.constant 0.000000e+00 : f32
    %928 = vector.broadcast %cst_89 : f32 to vector<8x128xf32>
    %929 = arith.cmpf ole, %19, %928 : vector<8x128xf32>
    %930 = arith.extui %929 : vector<8x128xi1> to vector<8x128xi32>
    %931 = arith.sitofp %930 : vector<8x128xi32> to vector<8x128xf32>
    %cst_90 = arith.constant 2.000000e+00 : f32
    %932 = vector.broadcast %cst_90 : f32 to vector<8x128xf32>
    %933 = arith.mulf %932, %931 : vector<8x128xf32>
    %934 = arith.subf %769, %933 : vector<8x128xf32>
    %935 = arith.mulf %934, %19 : vector<8x128xf32>
    %936 = arith.subf %935, %772 : vector<8x128xf32>
    %cst_91 = arith.constant 1.000000e+00 : f32
    %937 = vector.broadcast %cst_91 : f32 to vector<8x128xf32>
    %938 = arith.addf %936, %937 : vector<8x128xf32>
    %cst_92 = arith.constant 0.000000e+00 : f32
    %939 = vector.broadcast %cst_92 : f32 to vector<8x128xf32>
    %940 = arith.cmpf oge, %938, %939 : vector<8x128xf32>
    %cst_93 = arith.constant -1.000000e+29 : f32
    %941 = vector.broadcast %cst_93 : f32 to vector<8x128xf32>
    %942 = arith.cmpf ogt, %19, %941 : vector<8x128xf32>
    %943 = arith.andi %940, %942 : vector<8x128xi1>
    %cst_94 = arith.constant 1.000000e+00 : f32
    %944 = vector.broadcast %cst_94 : f32 to vector<8x128xf32>
    %945 = arith.subf %772, %944 : vector<8x128xf32>
    %946 = arith.divf %945, %934 : vector<8x128xf32>
    %cst_95 = arith.constant 0.000000e+00 : f32
    %947 = vector.broadcast %cst_95 : f32 to vector<8x128xf32>
    %948 = arith.select %943, %934, %947 : vector<8x128xi1>, vector<8x128xf32>
    %949 = arith.cmpf ogt, %948, %927 : vector<8x128xf32>
    %950 = arith.select %949, %946, %926 : vector<8x128xi1>, vector<8x128xf32>
    %951 = arith.select %949, %948, %927 : vector<8x128xi1>, vector<8x128xf32>
    %cst_96 = arith.constant 0.000000e+00 : f32
    %952 = vector.broadcast %cst_96 : f32 to vector<8x128xf32>
    %953 = arith.cmpf ole, %21, %952 : vector<8x128xf32>
    %954 = arith.extui %953 : vector<8x128xi1> to vector<8x128xi32>
    %955 = arith.sitofp %954 : vector<8x128xi32> to vector<8x128xf32>
    %cst_97 = arith.constant 2.000000e+00 : f32
    %956 = vector.broadcast %cst_97 : f32 to vector<8x128xf32>
    %957 = arith.mulf %956, %955 : vector<8x128xf32>
    %958 = arith.subf %780, %957 : vector<8x128xf32>
    %959 = arith.mulf %958, %21 : vector<8x128xf32>
    %960 = arith.subf %959, %783 : vector<8x128xf32>
    %cst_98 = arith.constant 1.000000e+00 : f32
    %961 = vector.broadcast %cst_98 : f32 to vector<8x128xf32>
    %962 = arith.addf %960, %961 : vector<8x128xf32>
    %cst_99 = arith.constant 0.000000e+00 : f32
    %963 = vector.broadcast %cst_99 : f32 to vector<8x128xf32>
    %964 = arith.cmpf oge, %962, %963 : vector<8x128xf32>
    %cst_100 = arith.constant -1.000000e+29 : f32
    %965 = vector.broadcast %cst_100 : f32 to vector<8x128xf32>
    %966 = arith.cmpf ogt, %21, %965 : vector<8x128xf32>
    %967 = arith.andi %964, %966 : vector<8x128xi1>
    %cst_101 = arith.constant 1.000000e+00 : f32
    %968 = vector.broadcast %cst_101 : f32 to vector<8x128xf32>
    %969 = arith.subf %783, %968 : vector<8x128xf32>
    %970 = arith.divf %969, %958 : vector<8x128xf32>
    %cst_102 = arith.constant 0.000000e+00 : f32
    %971 = vector.broadcast %cst_102 : f32 to vector<8x128xf32>
    %972 = arith.select %967, %958, %971 : vector<8x128xi1>, vector<8x128xf32>
    %973 = arith.cmpf ogt, %972, %951 : vector<8x128xf32>
    %974 = arith.select %973, %970, %950 : vector<8x128xi1>, vector<8x128xf32>
    %975 = arith.select %973, %972, %951 : vector<8x128xi1>, vector<8x128xf32>
    %c1_i32_103 = arith.constant 1 : i32
    %c0_104 = arith.constant 0 : index
    %c0_105 = arith.constant 0 : index
    %c0_106 = arith.constant 0 : index
    %c0_107 = arith.constant 0 : index
    %976 = vector.load %arg4[%c0_104, %c0_105, %c0_106, %c0_107] : memref<1x1x8x128xf32, #tpu.memory_space<vmem>>, vector<1x1x8x128xf32>
    %977 = vector.shape_cast %976 : vector<1x1x8x128xf32> to vector<8x128xf32>
    %978 = vector.shape_cast %975 : vector<8x128xf32> to vector<1x1x8x128xf32>
    tpu.vector_store %arg4[%c0_104, %c0_105, %c0_106, %c0_107], %978 {strides = array<i32>} : memref<1x1x8x128xf32, #tpu.memory_space<vmem>>, vector<1x1x8x128xf32>,
    %c0_108 = arith.constant 0 : index
    %c0_109 = arith.constant 0 : index
    %c0_110 = arith.constant 0 : index
    %c0_111 = arith.constant 0 : index
    %979 = vector.load %arg5[%c0_108, %c0_109, %c0_110, %c0_111] : memref<1x1x8x128xf32, #tpu.memory_space<vmem>>, vector<1x1x8x128xf32>
    %980 = vector.shape_cast %979 : vector<1x1x8x128xf32> to vector<8x128xf32>
    %981 = vector.shape_cast %974 : vector<8x128xf32> to vector<1x1x8x128xf32>
    tpu.vector_store %arg5[%c0_108, %c0_109, %c0_110, %c0_111], %981 {strides = array<i32>} : memref<1x1x8x128xf32, #tpu.memory_space<vmem>>, vector<1x1x8x128xf32>,
    return
  }
  func.func @transform_0(%arg0: i32, %arg1: i32) -> (i32, i32, i32, i32, i32) {
    %c0_i32 = arith.constant 0 : i32
    %c0_i32_0 = arith.constant 0 : i32
    %c0_i32_1 = arith.constant 0 : i32
    %c0_i32_2 = arith.constant 0 : i32
    return %arg0, %arg1, %c0_i32, %c0_i32_0, %c0_i32_1 : i32, i32, i32, i32, i32
  }
  func.func @transform_1(%arg0: i32, %arg1: i32) -> (i32, i32, i32, i32) {
    %c0_i32 = arith.constant 0 : i32
    %c0_i32_0 = arith.constant 0 : i32
    %c0_i32_1 = arith.constant 0 : i32
    %c0_i32_2 = arith.constant 0 : i32
    return %arg0, %c0_i32, %c0_i32_0, %c0_i32_1 : i32, i32, i32, i32
  }
  func.func @transform_2(%arg0: i32, %arg1: i32) -> (i32, i32, i32, i32) {
    %c0_i32 = arith.constant 0 : i32
    %c0_i32_0 = arith.constant 0 : i32
    %c0_i32_1 = arith.constant 0 : i32
    return %arg0, %arg1, %c0_i32, %c0_i32_0 : i32, i32, i32, i32
  }
  func.func @transform_3(%arg0: i32, %arg1: i32) -> (i32, i32, i32, i32) {
    %c0_i32 = arith.constant 0 : i32
    %c0_i32_0 = arith.constant 0 : i32
    %c0_i32_1 = arith.constant 0 : i32
    return %arg0, %arg1, %c0_i32, %c0_i32_0 : i32, i32, i32, i32
  }
}

</mosaic_0001>

<bundles_post_ra>
// kernel: tpu_custom_call.1
= control target key start
LH: loop header
LB: loop body
LE: loop exit
PB: predicated region body
PF: predicated region fallthrough
CT: control target
= control target key end

     0   :  { %9 = vsyncpa [#allocation3], 0  ;;  %s2997_s0 = inlined_call_operand.hbm [shape: f32[1,2,8,8,128], index: 0, kind: input, shape index: {}]   ;;  %s2998_s1 = inlined_call_operand.hbm [shape: f32[1,8,8,128], index: 1, kind: input, shape index: {}]   ;;  %s2999_s2 = inlined_call_operand.hbm [shape: f32[1,2,8,128], index: 2, kind: output, shape index: {0}]   ;;  %s3000_s3 = inlined_call_operand.hbm [shape: f32[1,2,8,128], index: 3, kind: output, shape index: {1}]  }
   0x1   :  { %11 = vsyncpa [#allocation3 + $0x1], 0 }
   0x2   :  { %12 = vsyncpa [#allocation6], 0 }
   0x3   :  { %13 = vsyncpa [#allocation4], 0 }
   0x4   :  { %15 = vsyncpa [#allocation4 + $0x1], 0 }
   0x5   :  { %16 = vsyncpa [#allocation9], 0 }
   0x6   :  { %18 = vsyncpa [#allocation9 + $0x1], 0  ;;  %s1787_s12 = smov 0   ;;  %s1789_s13 = smov 0  }
   0x7   :  { %s1791_s14 = smov 0   ;;  %s1793_s15 = smov 0  }
   0x8   :  { %s1795_s16 = smov 0   ;;  %s1797_s17 = smov 0  }
   0x9 LB: > { %s1313_s18 = sadd.s32 4294967295, %s1758_s17   ;;  %s1314_s19 = sadd.s32 4294967294, %s1758_s17   ;;  %s1758_s17 = sphi %s1797_s17, %s24_s17   ;;  %s1754_s16 = sphi %s1795_s16, %s3024_s16   ;;  %s1750_s15 = sphi %s1793_s15, %s3023_s15   ;;  %s1746_s14 = sphi %s1791_s14, %s3022_s14   ;;  %s1742_s13 = sphi %s1789_s13, %s3021_s13   ;;  %s1738_s12 = sphi %s1787_s12, %s3020_s12  }
   0xa   : > { %p58_p0 = scmp.ne.s32.totalorder %s1742_s13, %s1738_s12  ;;  %p1821_p1 = scmp.eq.s32.totalorder %s1313_s18, 0 }
   0xb   : > { %p1825_p2 = scmp.eq.s32.totalorder %s1313_s18, 1  ;;  %p116_p3 = scmp.eq.s32.totalorder %s1314_s19, 1 }
   0xc   : > { %s3005_s20 = scalar_select %p1821_p1, 1, 0 }
   0xd   : > { %s3006_s21 = scalar_select %p1825_p2, 1, 0 }
   0xe   : > { %p1831_p4 = por %p1821_p1, %p58_p0  ;;  %p1315_p5 = scmp.ge.s32.totalorder %s1758_s17, 1 }
   0xf   : > { %p1836_p6 = por %p116_p3, %p58_p0  ;;  %p151_p7 = scmp.lt.s32.totalorder %s1758_s17, 3 }
  0x10   : > { %s3007_s22 = scalar_select %p1831_p4, 1, 0 }
  0x11   : > { %s3008_s23 = scalar_select %p1836_p6, 1, 0 }
  0x12   : > { %p1841_p8 = pnand %p1315_p5, %p151_p7  ;;  %s1760_s25 = smov [#allocation5]  }
  0x13   : > { %s166_s26 = sshll.u32 %s1760_s25, 4  ;;  %s33_s28 = sadd.s32 1, %s1754_s16  ;;  %s167_s26 = int_to_ptr.vmem [resolvable:$true] %s166_s26 }
  0x14   : > { %s3009_s24 = scalar_select %p1841_p8, 1, 0 }
  0x15   : > { %p1487_p9 = pneg %p1841_p8  ;;  %s1582_s4 = scalar_lea.hbm %s2998_s1, 1024 }
  0x16   : > { %p1583_p12 = scmp.ne.s32.totalorder %s2998_s1, %s1582_s4  ;;  %p1589_p5 = scmp.lt.u32.totalorder %s1582_s4, %s2998_s1 }
  0x17   : > { %p1850_p11 = pnand %p1487_p9, %p1821_p1 }
  0x19   : > { %p1584_p13 = pneg %p1850_p11 }
  0x1b   : > { %p1585_p0 = pnand %p1584_p13, %p1583_p12 }
  0x1d   : > { %p1586_p3 = pneg %p1585_p0 }
  0x1f   : > { %p1591_p7 = pnand %p1589_p5, %p1586_p3 }
  0x21   : > { %1594 = shalt.err (!%p1591_p7)
}
  0x22   : > { %s1595_s9 = scalar_lea.vmem %s167_s26, 1024  ;;  %p1603_p1 = scmp.lt.s32.totalorder %s167_s26, %s167_s26 }
  0x23   : > { %p1596_p9 = scmp.ne.s32.totalorder %s167_s26, %s1595_s9  ;;  %p1604_p4 = scmp.lt.s32.totalorder %s1595_s9, %s1595_s9 }
  0x25   : > { %p1598_p10 = pnand %p1596_p9, %p1584_p13  ;;  %p1605_p8 = por %p1604_p4, %p1603_p1 }
  0x27   : > { %p1599_p6 = pneg %p1598_p10 }
  0x29   : > { %p1606_p2 = pnand %p1605_p8, %p1599_p6 }
  0x2b   : > { %1609 = shalt.err (!%p1606_p2)
}
  0x2c   : > { %s1761_s10 = smov 128   ;;  %s1762_s11 = smov 8  }
  0x2d   : > { %1490 = dma.hbm_to_vmem [thread:$0]  (!%p1850_p11), %s2998_s1, 1024, %s167_s26, [#allocation6], %s1761_s10, %s1761_s10, %s1762_s11  }
  0x2e   : > { %p34_p1 = scmp.ge.s32.totalorder %s33_s28, 2  ;;  %s45_s25 = sadd.s32 1, %s1746_s14 }
  0x2f   : > { %p52_p2 = scmp.ne.s32.totalorder %s1746_s14, %s1742_s13  ;;  %p53_p4 = scmp.eq.s32.totalorder %s1758_s17, 0 }
  0x30   : > { %s3026_s28 = smov (%p34_p1, %s33_s28), 0  ;;  %p3012_p8 = scmp.ne.s32.totalorder %s3006_s21, 0 }
  0x31   : > { %p1880_p6 = por %p53_p4, %p52_p2  ;;  %s41_s30 = ssub.s32 %s1754_s16, %s3026_s28 }
  0x32   : > { %p1886_p10 = por %p3012_p8, %p52_p2  ;;  %p1503_p12 = scmp.lt.s32.totalorder %s1758_s17, 2 }
  0x33   : > { %p43_p11 = scmp.eq.s32.totalorder %s41_s30, 0  ;;  %s180_s26 = sand.u32 1, %s1746_s14  }
  0x34   : > { %s1318_s4 = sshll.u32 %s180_s26, 6  ;;  %s1476_s6 = sshll.u32 %s1754_s16, 10 }
  0x35   : > { %s1895_s5 = scalar_select %p43_p11, %s1746_s14, %s45_s25  }
  0x36   : > { %s1901_s9 = scalar_lea.hbm %s2997_s0, %s1476_s6  ;;  %s184_s21 = scalar_lea.vmem [#allocation2], %s1318_s4 }
  0x37   : > { %s193_s18 = sshll.u32 %s184_s21, 4  ;;  %p1907_p13 = pnand %p1503_p12, %p1880_p6  ;;  %s1903_s18 = int_to_ptr.vmem [resolvable:$true] %s193_s18 }
  0x38   : > { %s1911_s25 = scalar_lea.sflag [#allocation3], %s180_s26  ;;  %s1610_s30 = scalar_lea.hbm %s1901_s9, 1024 }
  0x39   : > { %p1611_p0 = scmp.ne.s32.totalorder %s1901_s9, %s1610_s30  ;;  %p1612_p3 = pneg %p1907_p13 }
  0x3a   : > { %s1615_s29 = scalar_lea.hbm %s2997_s0, 2048  ;;  %p1616_p9 = scmp.lt.u32.totalorder %s1901_s9, %s2997_s0 }
  0x3b   : > { %p1613_p5 = pnand %p1612_p3, %p1611_p0  ;;  %p1617_p1 = scmp.lt.u32.totalorder %s1615_s29, %s1610_s30 }
  0x3c   : > { %p1619_p4 = scmp.lt.u32.totalorder %s1610_s30, %s1901_s9 }
  0x3d   : > { %p1614_p7 = pneg %p1613_p5  ;;  %p1618_p2 = por %p1617_p1, %p1616_p9 }
  0x3f   : > { %p1620_p6 = por %p1619_p4, %p1618_p2 }
  0x41   : > { %p1621_p8 = pnand %p1620_p6, %p1614_p7 }
  0x43   : > { %1624 = shalt.err (!%p1621_p8)
}
  0x44   : > { %s1625_s26 = scalar_lea.vmem %s1903_s18, 1024  ;;  %s1763_s21 = smov [#allocation2]  }
  0x45   : > { %p1626_p12 = scmp.ne.s32.totalorder %s1903_s18, %s1625_s26  ;;  %s1630_s4 = sshll.u32 %s1763_s21, 4  ;;  %s1631_s4 = int_to_ptr.vmem [resolvable:$false] %s1630_s4 }
  0x46   : > { %s1632_s6 = scalar_lea.vmem %s1631_s4, 2048  ;;  %p1633_p5 = scmp.lt.s32.totalorder %s1903_s18, %s1631_s4 }
  0x47   : > { %p1628_p11 = pnand %p1626_p12, %p1612_p3  ;;  %p1634_p9 = scmp.lt.s32.totalorder %s1632_s6, %s1625_s26 }
  0x49   : > { %p1629_p0 = pneg %p1628_p11  ;;  %p1635_p1 = por %p1634_p9, %p1633_p5 }
  0x4b   : > { %p1636_p2 = pnand %p1635_p1, %p1629_p0 }
  0x4d   : > { %1639 = shalt.err (!%p1636_p2)
}
  0x4e   : > { %1494 = dma.hbm_to_vmem [thread:$0]  (!%p1907_p13), %s1901_s9, 1024, %s1903_s18, %s1911_s25, %s1761_s10, %s1761_s10, %s1762_s11  }
  0x4f   : > { %p3015_p3 = scmp.ne.s32.totalorder %s3009_s24, 0 }
  0x50   : > { %s1945_s30 = sand.u32 (!%p3015_p3), 1, %s1742_s13   ;;  %p3016_p7 = scmp.ne.s32.totalorder (!%p3015_p3), %s3007_s22, 0 }
  0x51   : > { %205 = sbr.rel (%p3015_p3) target bundleno = 311 (0x137), region = 28  ;;  %s1322_s29 = sshll.u32 (!%p3015_p3), %s1945_s30, 6 }
  0x52   : > { %s208_s7 = scalar_lea.sflag (!%p3015_p3), [#allocation3], %s1945_s30  ;;  %s1949_s8 = scalar_lea.vmem (!%p3015_p3), [#allocation2], %s1322_s29 }
  0x58   : > { %1721 = dma.done.wait (%p3016_p7), %s208_s7, 1024  }
  0x59   : > { %1723 = vsyncadd (%p3016_p7), %s208_s7, 4294966272  ;;  %p3017_p13 = scmp.ne.s32.totalorder %s3005_s20, 0 }
  0x5b   : > { %1725 = dma.done.wait (%p3017_p13), [#allocation6], 1024  }
  0x5c   : > { %1727 = vsyncadd (%p3017_p13), [#allocation6], 4294966272  ;;  %v1960_v0 = vld [vmem:[%s1949_s8] sm:$0xff]  ;;  %v1963_v1 = vld [vmem:[%s1949_s8 + $0x8] sm:$0xff]  ;;  %v1764_v8 = vmov 0.0   ;;  %s1324_s20 = sshll.u32 %s1945_s30, 3 }
  0x5d   : > { %v1966_v2 = vld [vmem:[%s1949_s8 + $0x10] sm:$0xff]  ;;  %v1968_v3 = vld [vmem:[#allocation5] sm:$0xff]  ;;  %v1974_v5 = vld [vmem:[%s1949_s8 + $0x18] sm:$0xff]  ;;  %s1472_s22 = sshll.u32 %s1750_s15, 7  ;;  %s235_s24 = scalar_lea.vmem [#allocation7], %s1324_s20 }
  0x5e   : > { %v1971_v4 = vsub.f32 0.0, %v1968_v3  ;;  %vm256_vm0 = vcmp.ge.f32.partialorder %v1968_v3, %v1960_v0  ;;  %vm267_vm2 = vcmp.ge.f32.partialorder %v1968_v3, %v1963_v1  ;;  %vm278_vm4 = vcmp.ge.f32.partialorder %v1968_v3, %v1966_v2  ;;  %v1987_v6 = vld [vmem:[%s1949_s8 + $0x20] sm:$0xff]  ;;  %v1992_v7 = vld [vmem:[%s1949_s8 + $0x28] sm:$0xff]  ;;  %v2013_v19 = vld [vmem:[%s1949_s8 + $0x30] sm:$0xff]  ;;  %s1162_s10 = sshll.u32 %s235_s24, 4  ;;  %s2909_s11 = scalar_lea.vmem [#allocation8], %s1324_s20  ;;  %s2917_s10 = int_to_ptr.vmem [resolvable:$true] %s1162_s10 }
  0x5f   : > { %v1326_v9 = vsel %vm256_vm0, 1.0, %v1764_v8  ;;  %vm289_vm6 = vcmp.ge.f32.partialorder %v1968_v3, %v1974_v5  ;;  %v1328_v11 = vsel %vm267_vm2, 1.0, %v1764_v8  ;;  %v1330_v13 = vsel %vm278_vm4, 1.0, %v1764_v8  ;;  %v2026_v27 = vld [vmem:[%s1949_s8 + $0x38] sm:$0xff]  ;;  %v2037_v32 = vld [vmem:[#allocation5 + $0x8] sm:$0xff]  ;;  %s1177_s9 = sshll.u32 %s2909_s11, 4  ;;  %s2915_s25 = scalar_lea.hbm %s2999_s2, %s1472_s22  ;;  %s2926_s9 = int_to_ptr.vmem [resolvable:$true] %s1177_s9 }
  0x60   : > { %vm259_vm1 = vcmp.ge.f32.partialorder %v1971_v4, %v1960_v0  ;;  %vm270_vm3 = vcmp.ge.f32.partialorder %v1971_v4, %v1963_v1  ;;  %vm281_vm5 = vcmp.ge.f32.partialorder %v1971_v4, %v1966_v2  ;;  %vm292_vm7 = vcmp.ge.f32.partialorder %v1971_v4, %v1974_v5  ;;  %s2924_s21 = scalar_lea.hbm %s3000_s3, %s1472_s22  ;;  %s1142_s4 = scalar_lea.sflag [#allocation4], %s1945_s30 }
  0x61   : > { %v1327_v10 = vsel %vm259_vm1, 1.0, %v1764_v8  ;;  %v1329_v12 = vsel %vm270_vm3, 1.0, %v1764_v8  ;;  %v1331_v16 = vsel %vm281_vm5, 1.0, %v1764_v8  ;;  %vm300_vm8 = vcmp.ge.f32.partialorder %v1968_v3, %v1987_v6  ;;  %s1640_s6 = scalar_lea.vmem %s2917_s10, 128  ;;  %s1765_s29 = smov [#allocation7]  }
  0x62   : > { %v264_v14 = vsub.f32 %v1326_v9, %v1327_v10  ;;  %v275_v15 = vsub.f32 %v1328_v11, %v1329_v12  ;;  %v1332_v17 = vsel %vm289_vm6, 1.0, %v1764_v8  ;;  %v1333_v18 = vsel %vm292_vm7, 1.0, %v1764_v8  ;;  %p1641_p4 = scmp.ne.s32.totalorder %s2917_s10, %s1640_s6  ;;  %s1644_s7 = sshll.u32 %s1765_s29, 4  ;;  %s1645_s7 = int_to_ptr.vmem [resolvable:$false] %s1644_s7 }
  0x63   : > { %vm303_vm9 = vcmp.ge.f32.partialorder %v1971_v4, %v1987_v6  ;;  %vm311_vm10 = vcmp.ge.f32.partialorder %v1968_v3, %v1992_v7  ;;  %v2015_v20 = vadd.f32 %v1327_v10, %v1326_v9  ;;  %v286_v21 = vsub.f32 %v1330_v13, %v1331_v16  ;;  %p1647_p12 = scmp.lt.s32.totalorder %s2917_s10, %s1645_s7 }
  0x64   : > { %v297_v22 = vsub.f32 %v1332_v17, %v1333_v18  ;;  %vm314_vm11 = vcmp.ge.f32.partialorder %v1971_v4, %v1992_v7  ;;  %v2019_v23 = vadd.f32 %v1329_v12, %v1328_v11  ;;  %v2021_v24 = vadd.f32 %v1331_v16, %v1330_v13  ;;  %p1642_p6 = pnand %p1641_p4, %p1886_p10 }
  0x65   : > { %v1334_v25 = vsel %vm300_vm8, 1.0, %v1764_v8  ;;  %v1335_v26 = vsel %vm303_vm9, 1.0, %v1764_v8  ;;  %v2029_v28 = vmul.f32 %v264_v14, %v1968_v3  ;;  %v2032_v29 = vmul.f32 %v275_v15, %v1968_v3 }
  0x66   : > { %v2034_v30 = vadd.f32 %v1333_v18, %v1332_v17  ;;  %v1336_v31 = vsel %vm311_vm10, 1.0, %v1764_v8  ;;  %v308_v33 = vsub.f32 %v1334_v25, %v1335_v26  ;;  %v1337_v34 = vsel %vm314_vm11, 1.0, %v1764_v8  ;;  %p1643_p8 = pneg %p1642_p6 }
  0x67   : > { %vm322_vm12 = vcmp.ge.f32.partialorder %v1968_v3, %v2013_v19  ;;  %vm325_vm13 = vcmp.ge.f32.partialorder %v1971_v4, %v2013_v19  ;;  %v2045_v35 = vmul.f32 %v286_v21, %v1968_v3  ;;  %v2048_v36 = vmul.f32 %v297_v22, %v1968_v3 }
  0x68   : > { %v2050_v37 = vadd.f32 %v1335_v26, %v1334_v25  ;;  %v319_v38 = vsub.f32 %v1336_v31, %v1337_v34  ;;  %vm333_vm14 = vcmp.ge.f32.partialorder %v1968_v3, %v2026_v27  ;;  %vm336_vm15 = vcmp.ge.f32.partialorder %v1971_v4, %v2026_v27 }
  0x69   : > { %v2057_v39 = vsub.f32 0.0, %v2037_v32  ;;  %vm349_vm0 = vcmp.ge.f32.partialorder %v2037_v32, %v1960_v0  ;;  %v2061_v40 = vadd.f32 %v1337_v34, %v1336_v31  ;;  %v1338_v41 = vsel %vm322_vm12, 1.0, %v1764_v8 }
  0x6a   : > { %v1339_v42 = vsel %vm325_vm13, 1.0, %v1764_v8  ;;  %vm360_vm1 = vcmp.ge.f32.partialorder %v2037_v32, %v1963_v1  ;;  %v2068_v43 = vmul.f32 %v308_v33, %v1968_v3  ;;  %v2075_v45 = vmul.f32 %v319_v38, %v1968_v3 }
  0x6b   : > { %v330_v44 = vsub.f32 %v1338_v41, %v1339_v42  ;;  %vm352_vm2 = vcmp.ge.f32.partialorder %v2057_v39, %v1960_v0  ;;  %vm363_vm3 = vcmp.ge.f32.partialorder %v2057_v39, %v1963_v1  ;;  %v1340_v46 = vsel %vm333_vm14, 1.0, %v1764_v8 }
  0x6c   : > { %v1341_v47 = vsel %vm336_vm15, 1.0, %v1764_v8  ;;  %v1342_v48 = vsel %vm349_vm0, 1.0, %v1764_v8  ;;  %v1343_v49 = vsel %vm352_vm2, 1.0, %v1764_v8  ;;  %v1344_v50 = vsel %vm360_vm1, 1.0, %v1764_v8 }
  0x6d   : > { %v1345_v51 = vsel %vm363_vm3, 1.0, %v1764_v8  ;;  %vm371_vm4 = vcmp.ge.f32.partialorder %v2037_v32, %v1966_v2  ;;  %v357_v52 = vsub.f32 %v1342_v48, %v1343_v49  ;;  %vm374_vm5 = vcmp.ge.f32.partialorder %v2057_v39, %v1966_v2 }
  0x6e   : > { %vm382_vm6 = vcmp.ge.f32.partialorder %v2037_v32, %v1974_v5  ;;  %vm385_vm7 = vcmp.ge.f32.partialorder %v2057_v39, %v1974_v5  ;;  %v2091_v53 = vadd.f32 %v1339_v42, %v1338_v41  ;;  %v2094_v54 = vmul.f32 %v330_v44, %v1968_v3  ;;  %v2135_v41 = vld [vmem:[#allocation5 + $0x10] sm:$0xff] }
  0x6f   : > { %v2096_v55 = vadd.f32 %v1341_v47, %v1340_v46  ;;  %v368_v56 = vsub.f32 %v1344_v50, %v1345_v51  ;;  %v341_v57 = vsub.f32 %v1340_v46, %v1341_v47  ;;  %v1346_v58 = vsel %vm371_vm4, 1.0, %v1764_v8 }
  0x70   : > { %v1347_v59 = vsel %vm374_vm5, 1.0, %v1764_v8  ;;  %vm393_vm8 = vcmp.ge.f32.partialorder %v2037_v32, %v1987_v6  ;;  %v355_v60 = vadd.f32 %v1343_v49, %v1342_v48  ;;  %v1348_v62 = vsel %vm382_vm6, 1.0, %v1764_v8 }
  0x71   : > { %v379_v61 = vsub.f32 %v1346_v58, %v1347_v59  ;;  %v1349_v63 = vsel %vm385_vm7, 1.0, %v1764_v8  ;;  %v358_v4 = vmul.f32 %v357_v52, %v2037_v32  ;;  %v366_v9 = vadd.f32 %v1345_v51, %v1344_v50 }
  0x72   : > { %v390_v10 = vsub.f32 %v1348_v62, %v1349_v63  ;;  %vm396_vm9 = vcmp.ge.f32.partialorder %v2057_v39, %v1987_v6  ;;  %v369_v11 = vmul.f32 %v368_v56, %v2037_v32  ;;  %v377_v12 = vadd.f32 %v1347_v59, %v1346_v58 }
  0x73   : > { %v1350_v13 = vsel %vm393_vm8, 1.0, %v1764_v8  ;;  %v1351_v14 = vsel %vm396_vm9, 1.0, %v1764_v8  ;;  %v380_v15 = vmul.f32 %v379_v61, %v2037_v32  ;;  %v388_v16 = vadd.f32 %v1349_v63, %v1348_v62 }
  0x74   : > { %v401_v17 = vsub.f32 %v1350_v13, %v1351_v14  ;;  %vm404_vm10 = vcmp.ge.f32.partialorder %v2037_v32, %v1992_v7  ;;  %v391_v18 = vmul.f32 %v390_v10, %v2037_v32  ;;  %vm407_vm11 = vcmp.ge.f32.partialorder %v2057_v39, %v1992_v7 }
  0x75   : > { %vm415_vm12 = vcmp.ge.f32.partialorder %v2037_v32, %v2013_v19  ;;  %vm418_vm13 = vcmp.ge.f32.partialorder %v2057_v39, %v2013_v19  ;;  %v2121_v21 = vmul.f32 %v341_v57, %v1968_v3  ;;  %v2124_v22 = vadd.f32 %v355_v60, %v2015_v20 }
  0x76   : > { %v2127_v25 = vadd.f32 %v366_v9, %v2019_v23  ;;  %v399_v26 = vadd.f32 %v1351_v14, %v1350_v13  ;;  %v2130_v31 = vadd.f32 %v358_v4, %v2029_v28  ;;  %v402_v33 = vmul.f32 %v401_v17, %v2037_v32 }
  0x77   : > { %v1352_v34 = vsel %vm404_vm10, 1.0, %v1764_v8  ;;  %v1353_v38 = vsel %vm407_vm11, 1.0, %v1764_v8  ;;  %v2138_v3 = vadd.f32 %v369_v11, %v2032_v29  ;;  %v1354_v42 = vsel %vm415_vm12, 1.0, %v1764_v8 }
  0x78   : > { %v412_v20 = vsub.f32 %v1352_v34, %v1353_v38  ;;  %v1355_v23 = vsel %vm418_vm13, 1.0, %v1764_v8  ;;  %v378_v44 = vadd.f32 %v377_v12, %v2021_v24  ;;  %v2144_v28 = vadd.f32 %v380_v15, %v2045_v35 }
  0x79   : > { %v389_v46 = vadd.f32 %v388_v16, %v2034_v30  ;;  %v2148_v47 = vadd.f32 %v391_v18, %v2048_v36  ;;  %v2151_v48 = vadd.f32 %v399_v26, %v2050_v37  ;;  %vm426_vm14 = vcmp.ge.f32.partialorder %v2037_v32, %v2026_v27 }
  0x7a   : > { %vm429_vm15 = vcmp.ge.f32.partialorder %v2057_v39, %v2026_v27  ;;  %v2158_v29 = vsub.f32 0.0, %v2135_v41  ;;  %v2161_v24 = vadd.f32 %v402_v33, %v2068_v43  ;;  %v410_v35 = vadd.f32 %v1353_v38, %v1352_v34 }
  0x7b   : > { %v421_v30 = vadd.f32 %v1355_v23, %v1354_v42  ;;  %vm442_vm0 = vcmp.ge.f32.partialorder %v2135_v41, %v1960_v0  ;;  %v413_v36 = vmul.f32 %v412_v20, %v2037_v32  ;;  %v423_v37 = vsub.f32 %v1354_v42, %v1355_v23 }
  0x7c   : > { %vm445_vm1 = vcmp.ge.f32.partialorder %v2158_v29, %v1960_v0  ;;  %vm453_vm2 = vcmp.ge.f32.partialorder %v2135_v41, %v1963_v1  ;;  %v1356_v39 = vsel %vm426_vm14, 1.0, %v1764_v8  ;;  %v1357_v49 = vsel %vm429_vm15, 1.0, %v1764_v8 }
  0x7d   : > { %v1358_v43 = vsel %vm442_vm0, 1.0, %v1764_v8  ;;  %v1359_v50 = vsel %vm445_vm1, 1.0, %v1764_v8  ;;  %v434_v51 = vsub.f32 %v1356_v39, %v1357_v49  ;;  %vm456_vm3 = vcmp.ge.f32.partialorder %v2158_v29, %v1963_v1 }
  0x7e   : > { %v450_v52 = vsub.f32 %v1358_v43, %v1359_v50  ;;  %vm464_vm4 = vcmp.ge.f32.partialorder %v2135_v41, %v1966_v2  ;;  %v2179_v56 = vadd.f32 %v410_v35, %v2061_v40  ;;  %v1360_v57 = vsel %vm453_vm2, 1.0, %v1764_v8  ;;  %v2244_v35 = vld [vmem:[#allocation5 + $0x18] sm:$0xff] }
  0x7f   : > { %v1361_v58 = vsel %vm456_vm3, 1.0, %v1764_v8  ;;  %vm467_vm5 = vcmp.ge.f32.partialorder %v2158_v29, %v1966_v2  ;;  %v2186_v59 = vadd.f32 %v421_v30, %v2091_v53  ;;  %v424_v60 = vmul.f32 %v423_v37, %v2037_v32 }
  0x80   : > { %v432_v61 = vadd.f32 %v1357_v49, %v1356_v39  ;;  %v461_v62 = vsub.f32 %v1360_v57, %v1361_v58  ;;  %v1362_v63 = vsel %vm464_vm4, 1.0, %v1764_v8  ;;  %v1363_v4 = vsel %vm467_vm5, 1.0, %v1764_v8 }
  0x81   : > { %vm475_vm6 = vcmp.ge.f32.partialorder %v2135_v41, %v1974_v5  ;;  %vm478_vm7 = vcmp.ge.f32.partialorder %v2158_v29, %v1974_v5  ;;  %v2196_v40 = vadd.f32 %v413_v36, %v2075_v45  ;;  %v435_v53 = vmul.f32 %v434_v51, %v2037_v32 }
  0x82   : > { %v448_v9 = vadd.f32 %v1359_v50, %v1358_v43  ;;  %v451_v10 = vmul.f32 %v450_v52, %v2135_v41  ;;  %v472_v11 = vsub.f32 %v1362_v63, %v1363_v4  ;;  %v1364_v12 = vsel %vm475_vm6, 1.0, %v1764_v8 }
  0x83   : > { %v1365_v13 = vsel %vm478_vm7, 1.0, %v1764_v8  ;;  %vm486_vm8 = vcmp.ge.f32.partialorder %v2135_v41, %v1987_v6  ;;  %v2205_v14 = vadd.f32 %v424_v60, %v2094_v54  ;;  %v459_v15 = vadd.f32 %v1361_v58, %v1360_v57 }
  0x84   : > { %v462_v45 = vmul.f32 %v461_v62, %v2135_v41  ;;  %v470_v16 = vadd.f32 %v1363_v4, %v1362_v63  ;;  %v2209_v32 = vadd.f32 %v432_v61, %v2096_v55  ;;  %v481_v17 = vadd.f32 %v1365_v13, %v1364_v12 }
  0x85   : > { %v483_v18 = vsub.f32 %v1364_v12, %v1365_v13  ;;  %vm489_vm9 = vcmp.ge.f32.partialorder %v2158_v29, %v1987_v6  ;;  %v2214_v26 = vadd.f32 %v435_v53, %v2121_v21  ;;  %v2217_v33 = vadd.f32 %v448_v9, %v2124_v22 }
  0x86   : > { %v2220_v54 = vadd.f32 %v451_v10, %v2130_v31  ;;  %v1366_v34 = vsel %vm486_vm8, 1.0, %v1764_v8  ;;  %v473_v38 = vmul.f32 %v472_v11, %v2135_v41  ;;  %v1367_v55 = vsel %vm489_vm9, 1.0, %v1764_v8 }
  0x87   : > { %vm497_vm10 = vcmp.ge.f32.partialorder %v2135_v41, %v1992_v7  ;;  %vm500_vm11 = vcmp.ge.f32.partialorder %v2158_v29, %v1992_v7  ;;  %v2230_v21 = vadd.f32 %v459_v15, %v2127_v25  ;;  %v2233_v22 = vadd.f32 %v462_v45, %v2138_v3 }
  0x88   : > { %v2235_v31 = vadd.f32 %v470_v16, %v378_v44  ;;  %vm508_vm12 = vcmp.ge.f32.partialorder %v2135_v41, %v2013_v19  ;;  %v2239_v20 = vadd.f32 %v481_v17, %v389_v46  ;;  %v484_v42 = vmul.f32 %v483_v18, %v2135_v41 }
  0x89   : > { %v494_v23 = vsub.f32 %v1366_v34, %v1367_v55  ;;  %vm511_vm13 = vcmp.ge.f32.partialorder %v2158_v29, %v2013_v19  ;;  %v492_v25 = vadd.f32 %v1367_v55, %v1366_v34  ;;  %v1368_v30 = vsel %vm497_vm10, 1.0, %v1764_v8 }
  0x8a   : > { %v1369_v3 = vsel %vm500_vm11, 1.0, %v1764_v8  ;;  %vm519_vm14 = vcmp.ge.f32.partialorder %v2135_v41, %v2026_v27  ;;  %v2251_v44 = vadd.f32 %v473_v38, %v2144_v28  ;;  %v1370_v36 = vsel %vm508_vm12, 1.0, %v1764_v8 }
  0x8b   : > { %v505_v46 = vsub.f32 %v1368_v30, %v1369_v3  ;;  %v1371_v37 = vsel %vm511_vm13, 1.0, %v1764_v8  ;;  %vm522_vm15 = vcmp.ge.f32.partialorder %v2158_v29, %v2026_v27  ;;  %v2258_v49 = vsub.f32 0.0, %v2244_v35 }
  0x8c   : > { %v516_v39 = vsub.f32 %v1370_v36, %v1371_v37  ;;  %vm535_vm0 = vcmp.ge.f32.partialorder %v2244_v35, %v1960_v0  ;;  %v495_v43 = vmul.f32 %v494_v23, %v2135_v41  ;;  %v503_v50 = vadd.f32 %v1369_v3, %v1368_v30 }
  0x8d   : > { %v1372_v28 = vsel %vm519_vm14, 1.0, %v1764_v8  ;;  %v1373_v51 = vsel %vm522_vm15, 1.0, %v1764_v8  ;;  %v2266_v52 = vadd.f32 %v484_v42, %v2148_v47  ;;  %v2269_v57 = vadd.f32 %v492_v25, %v2151_v48 }
  0x8e   : > { %v527_v29 = vsub.f32 %v1372_v28, %v1373_v51  ;;  %vm538_vm1 = vcmp.ge.f32.partialorder %v2258_v49, %v1960_v0  ;;  %v1374_v58 = vsel %vm535_vm0, 1.0, %v1764_v8  ;;  %vm546_vm2 = vcmp.ge.f32.partialorder %v2244_v35, %v1963_v1 }
  0x8f   : > { %v1375_v60 = vsel %vm538_vm1, 1.0, %v1764_v8  ;;  %vm549_vm3 = vcmp.ge.f32.partialorder %v2258_v49, %v1963_v1  ;;  %v506_v47 = vmul.f32 %v505_v46, %v2135_v41  ;;  %v514_v61 = vadd.f32 %v1371_v37, %v1370_v36 }
  0x90   : > { %v517_v48 = vmul.f32 %v516_v39, %v2135_v41  ;;  %v543_v62 = vsub.f32 %v1374_v58, %v1375_v60  ;;  %v2282_v63 = vadd.f32 %v495_v43, %v2161_v24  ;;  %v2285_v4 = vadd.f32 %v503_v50, %v2179_v56  ;;  %v2344_v39 = vld [vmem:[#allocation5 + $0x20] sm:$0xff] }
  0x91   : > { %vm557_vm4 = vcmp.ge.f32.partialorder %v2244_v35, %v1966_v2  ;;  %vm560_vm5 = vcmp.ge.f32.partialorder %v2258_v49, %v1966_v2  ;;  %v525_v53 = vadd.f32 %v1373_v51, %v1372_v28  ;;  %v528_v9 = vmul.f32 %v527_v29, %v2135_v41 }
  0x92   : > { %v1376_v10 = vsel %vm546_vm2, 1.0, %v1764_v8  ;;  %v1377_v11 = vsel %vm549_vm3, 1.0, %v1764_v8  ;;  %v541_v12 = vadd.f32 %v1375_v60, %v1374_v58  ;;  %v544_v24 = vmul.f32 %v543_v62, %v2244_v35 }
  0x93   : > { %v1378_v13 = vsel %vm557_vm4, 1.0, %v1764_v8  ;;  %v1379_v56 = vsel %vm560_vm5, 1.0, %v1764_v8  ;;  %v2298_v15 = vadd.f32 %v506_v47, %v2196_v40  ;;  %v2301_v45 = vadd.f32 %v514_v61, %v2186_v59 }
  0x94   : > { %v2304_v16 = vadd.f32 %v517_v48, %v2205_v14  ;;  %vm568_vm6 = vcmp.ge.f32.partialorder %v2244_v35, %v1974_v5  ;;  %v552_v41 = vadd.f32 %v1377_v11, %v1376_v10  ;;  %vm571_vm7 = vcmp.ge.f32.partialorder %v2258_v49, %v1974_v5 }
  0x95   : > { %vm579_vm8 = vcmp.ge.f32.partialorder %v2244_v35, %v1987_v6  ;;  %vm582_vm9 = vcmp.ge.f32.partialorder %v2258_v49, %v1987_v6  ;;  %v526_v40 = vadd.f32 %v525_v53, %v2209_v32  ;;  %v554_v59 = vsub.f32 %v1376_v10, %v1377_v11 }
  0x96   : > { %v563_v17 = vadd.f32 %v1379_v56, %v1378_v13  ;;  %v565_v18 = vsub.f32 %v1378_v13, %v1379_v56  ;;  %v2316_v14 = vadd.f32 %v528_v9, %v2214_v26  ;;  %v2319_v34 = vadd.f32 %v541_v12, %v2217_v33 }
  0x97   : > { %v2322_v38 = vadd.f32 %v544_v24, %v2220_v54  ;;  %v1380_v55 = vsel %vm568_vm6, 1.0, %v1764_v8  ;;  %v1381_v42 = vsel %vm571_vm7, 1.0, %v1764_v8  ;;  %v1382_v23 = vsel %vm579_vm8, 1.0, %v1764_v8 }
  0x98   : > { %v1383_v32 = vsel %vm582_vm9, 1.0, %v1764_v8  ;;  %vm590_vm10 = vcmp.ge.f32.partialorder %v2244_v35, %v1992_v7  ;;  %v2331_v26 = vadd.f32 %v552_v41, %v2230_v21  ;;  %v576_v25 = vsub.f32 %v1380_v55, %v1381_v42 }
  0x99   : > { %v587_v33 = vsub.f32 %v1382_v23, %v1383_v32  ;;  %vm593_vm11 = vcmp.ge.f32.partialorder %v2258_v49, %v1992_v7  ;;  %v555_v54 = vmul.f32 %v554_v59, %v2244_v35  ;;  %v2337_v30 = vadd.f32 %v563_v17, %v2235_v31 }
  0x9a   : > { %v566_v3 = vmul.f32 %v565_v18, %v2244_v35  ;;  %vm601_vm12 = vcmp.ge.f32.partialorder %v2244_v35, %v2013_v19  ;;  %v574_v46 = vadd.f32 %v1381_v42, %v1380_v55  ;;  %v585_v36 = vadd.f32 %v1383_v32, %v1382_v23 }
  0x9b   : > { %v1384_v21 = vsel %vm590_vm10, 1.0, %v1764_v8  ;;  %v1385_v37 = vsel %vm593_vm11, 1.0, %v1764_v8  ;;  %vm604_vm13 = vcmp.ge.f32.partialorder %v2258_v49, %v2013_v19  ;;  %vm612_vm14 = vcmp.ge.f32.partialorder %v2244_v35, %v2026_v27 }
  0x9c   : > { %v598_v43 = vsub.f32 %v1384_v21, %v1385_v37  ;;  %vm615_vm15 = vcmp.ge.f32.partialorder %v2258_v49, %v2026_v27  ;;  %v577_v31 = vmul.f32 %v576_v25, %v2244_v35  ;;  %v588_v50 = vmul.f32 %v587_v33, %v2244_v35 }
  0x9d   : > { %v1386_v28 = vsel %vm601_vm12, 1.0, %v1764_v8  ;;  %v1387_v51 = vsel %vm604_vm13, 1.0, %v1764_v8  ;;  %v1388_v58 = vsel %vm612_vm14, 1.0, %v1764_v8  ;;  %v1389_v60 = vsel %vm615_vm15, 1.0, %v1764_v8 }
  0x9e   : > { %v609_v29 = vsub.f32 %v1386_v28, %v1387_v51  ;;  %v2359_v47 = vsub.f32 0.0, %v2344_v39  ;;  %v2362_v61 = vadd.f32 %v555_v54, %v2233_v22  ;;  %v2365_v49 = vadd.f32 %v566_v3, %v2251_v44 }
  0x9f   : > { %v2368_v48 = vadd.f32 %v574_v46, %v2239_v20  ;;  %vm628_vm0 = vcmp.ge.f32.partialorder %v2344_v39, %v1960_v0  ;;  %v596_v62 = vadd.f32 %v1385_v37, %v1384_v21  ;;  %v599_v53 = vmul.f32 %v598_v43, %v2244_v35 }
  0xa0   : > { %v607_v9 = vadd.f32 %v1387_v51, %v1386_v28  ;;  %vm631_vm1 = vcmp.ge.f32.partialorder %v2359_v47, %v1960_v0  ;;  %v2376_v10 = vadd.f32 %v585_v36, %v2269_v57  ;;  %v610_v22 = vmul.f32 %v609_v29, %v2244_v35  ;;  %v2447_v51 = vld [vmem:[#allocation5 + $0x28] sm:$0xff] }
  0xa1   : > { %v618_v44 = vadd.f32 %v1389_v60, %v1388_v58  ;;  %v620_v11 = vsub.f32 %v1388_v58, %v1389_v60  ;;  %v578_v20 = vadd.f32 %v577_v31, %v2266_v52  ;;  %v2381_v12 = vadd.f32 %v588_v50, %v2282_v63 }
  0xa2   : > { %v1390_v24 = vsel %vm628_vm0, 1.0, %v1764_v8  ;;  %v1391_v13 = vsel %vm631_vm1, 1.0, %v1764_v8  ;;  %vm639_vm2 = vcmp.ge.f32.partialorder %v2344_v39, %v1963_v1  ;;  %vm642_vm3 = vcmp.ge.f32.partialorder %v2359_v47, %v1963_v1 }
  0xa3   : > { %vm650_vm4 = vcmp.ge.f32.partialorder %v2344_v39, %v1966_v2  ;;  %vm653_vm5 = vcmp.ge.f32.partialorder %v2359_v47, %v1966_v2  ;;  %v2394_v52 = vadd.f32 %v596_v62, %v2285_v4  ;;  %v2397_v57 = vadd.f32 %v599_v53, %v2298_v15 }
  0xa4   : > { %v2400_v63 = vadd.f32 %v607_v9, %v2301_v45  ;;  %v636_v56 = vsub.f32 %v1390_v24, %v1391_v13  ;;  %v2403_v41 = vadd.f32 %v610_v22, %v2304_v16  ;;  %v2405_v59 = vadd.f32 %v618_v44, %v526_v40 }
  0xa5   : > { %v621_v17 = vmul.f32 %v620_v11, %v2244_v35  ;;  %vm661_vm6 = vcmp.ge.f32.partialorder %v2344_v39, %v1974_v5  ;;  %v1392_v4 = vsel %vm639_vm2, 1.0, %v1764_v8  ;;  %v1393_v18 = vsel %vm642_vm3, 1.0, %v1764_v8 }
  0xa6   : > { %v1394_v15 = vsel %vm650_vm4, 1.0, %v1764_v8  ;;  %v1395_v45 = vsel %vm653_vm5, 1.0, %v1764_v8  ;;  %v634_v55 = vadd.f32 %v1391_v13, %v1390_v24  ;;  %v647_v42 = vsub.f32 %v1392_v4, %v1393_v18 }
  0xa7   : > { %vm664_vm7 = vcmp.ge.f32.partialorder %v2359_v47, %v1974_v5  ;;  %vm672_vm8 = vcmp.ge.f32.partialorder %v2344_v39, %v1987_v6  ;;  %v637_v35 = vmul.f32 %v636_v56, %v2344_v39  ;;  %v658_v16 = vsub.f32 %v1394_v15, %v1395_v45 }
  0xa8   : > { %v1396_v40 = vsel %vm661_vm6, 1.0, %v1764_v8  ;;  %v1397_v23 = vsel %vm664_vm7, 1.0, %v1764_v8  ;;  %v645_v32 = vadd.f32 %v1393_v18, %v1392_v4  ;;  %v656_v25 = vadd.f32 %v1395_v45, %v1394_v15 }
  0xa9   : > { %v669_v33 = vsub.f32 %v1396_v40, %v1397_v23  ;;  %vm675_vm9 = vcmp.ge.f32.partialorder %v2359_v47, %v1987_v6  ;;  %v1398_v54 = vsel %vm672_vm8, 1.0, %v1764_v8  ;;  %vm683_vm10 = vcmp.ge.f32.partialorder %v2344_v39, %v1992_v7 }
  0xaa   : > { %v1399_v3 = vsel %vm675_vm9, 1.0, %v1764_v8  ;;  %vm686_vm11 = vcmp.ge.f32.partialorder %v2359_v47, %v1992_v7  ;;  %v2430_v46 = vadd.f32 %v621_v17, %v2316_v14  ;;  %v2433_v36 = vadd.f32 %v634_v55, %v2319_v34 }
  0xab   : > { %v648_v21 = vmul.f32 %v647_v42, %v2344_v39  ;;  %v680_v37 = vsub.f32 %v1398_v54, %v1399_v3  ;;  %v2437_v43 = vadd.f32 %v637_v35, %v2322_v38  ;;  %v659_v31 = vmul.f32 %v658_v16, %v2344_v39 }
  0xac   : > { %vm694_vm12 = vcmp.ge.f32.partialorder %v2344_v39, %v2013_v19  ;;  %vm697_vm13 = vcmp.ge.f32.partialorder %v2359_v47, %v2013_v19  ;;  %v667_v50 = vadd.f32 %v1397_v23, %v1396_v40  ;;  %v670_v14 = vmul.f32 %v669_v33, %v2344_v39 }
  0xad   : > { %v1400_v34 = vsel %vm683_vm10, 1.0, %v1764_v8  ;;  %v1401_v28 = vsel %vm686_vm11, 1.0, %v1764_v8  ;;  %v2450_v38 = vadd.f32 %v645_v32, %v2331_v26  ;;  %v2453_v29 = vadd.f32 %v656_v25, %v2337_v30 }
  0xae   : > { %v678_v58 = vadd.f32 %v1399_v3, %v1398_v54  ;;  %v681_v60 = vmul.f32 %v680_v37, %v2344_v39  ;;  %v2457_v62 = vadd.f32 %v648_v21, %v2362_v61  ;;  %v691_v53 = vsub.f32 %v1400_v34, %v1401_v28 }
  0xaf   : > { %v1402_v9 = vsel %vm694_vm12, 1.0, %v1764_v8  ;;  %v1403_v22 = vsel %vm697_vm13, 1.0, %v1764_v8  ;;  %v2462_v44 = vadd.f32 %v659_v31, %v2365_v49  ;;  %v689_v11 = vadd.f32 %v1401_v28, %v1400_v34 }
  0xb0   : > { %v702_v26 = vsub.f32 %v1402_v9, %v1403_v22  ;;  %v2465_v24 = vsub.f32 0.0, %v2447_v51  ;;  %v2468_v30 = vadd.f32 %v667_v50, %v2368_v48  ;;  %v2470_v13 = vadd.f32 %v670_v14, %v578_v20 }
  0xb1   : > { %vm705_vm14 = vcmp.ge.f32.partialorder %v2344_v39, %v2026_v27  ;;  %vm708_vm15 = vcmp.ge.f32.partialorder %v2359_v47, %v2026_v27  ;;  %v2477_v61 = vadd.f32 %v678_v58, %v2376_v10  ;;  %v2480_v49 = vadd.f32 %v681_v60, %v2381_v12 }
  0xb2   : > { %v700_v56 = vadd.f32 %v1403_v22, %v1402_v9  ;;  %vm721_vm0 = vcmp.ge.f32.partialorder %v2447_v51, %v1960_v0  ;;  %v692_v48 = vmul.f32 %v691_v53, %v2344_v39  ;;  %vm724_vm1 = vcmp.ge.f32.partialorder %v2465_v24, %v1960_v0 }
  0xb3   : > { %vm732_vm2 = vcmp.ge.f32.partialorder %v2447_v51, %v1963_v1  ;;  %vm735_vm3 = vcmp.ge.f32.partialorder %v2465_v24, %v1963_v1  ;;  %v2492_v47 = vadd.f32 %v689_v11, %v2394_v52  ;;  %v703_v10 = vmul.f32 %v702_v26, %v2344_v39  ;;  %v2564_v26 = vld [vmem:[#allocation5 + $0x30] sm:$0xff] }
  0xb4   : > { %v1404_v20 = vsel %vm705_vm14, 1.0, %v1764_v8  ;;  %v1405_v12 = vsel %vm708_vm15, 1.0, %v1764_v8  ;;  %v1406_v4 = vsel %vm721_vm0, 1.0, %v1764_v8  ;;  %v1407_v18 = vsel %vm724_vm1, 1.0, %v1764_v8 }
  0xb5   : > { %v713_v17 = vsub.f32 %v1404_v20, %v1405_v12  ;;  %vm743_vm4 = vcmp.ge.f32.partialorder %v2447_v51, %v1966_v2  ;;  %v2502_v15 = vadd.f32 %v700_v56, %v2400_v63  ;;  %v729_v45 = vsub.f32 %v1406_v4, %v1407_v18 }
  0xb6   : > { %v1408_v52 = vsel %vm732_vm2, 1.0, %v1764_v8  ;;  %v1409_v55 = vsel %vm735_vm3, 1.0, %v1764_v8  ;;  %v2507_v42 = vadd.f32 %v692_v48, %v2397_v57  ;;  %vm746_vm5 = vcmp.ge.f32.partialorder %v2465_v24, %v1966_v2 }
  0xb7   : > { %v740_v35 = vsub.f32 %v1408_v52, %v1409_v55  ;;  %vm754_vm6 = vcmp.ge.f32.partialorder %v2447_v51, %v1974_v5  ;;  %v2514_v16 = vadd.f32 %v703_v10, %v2403_v41  ;;  %v711_v63 = vadd.f32 %v1405_v12, %v1404_v20 }
  0xb8   : > { %v1410_v40 = vsel %vm743_vm4, 1.0, %v1764_v8  ;;  %v1411_v23 = vsel %vm746_vm5, 1.0, %v1764_v8  ;;  %v714_v32 = vmul.f32 %v713_v17, %v2344_v39  ;;  %v727_v25 = vadd.f32 %v1407_v18, %v1406_v4 }
  0xb9   : > { %v751_v57 = vsub.f32 %v1410_v40, %v1411_v23  ;;  %vm757_vm7 = vcmp.ge.f32.partialorder %v2465_v24, %v1974_v5  ;;  %v730_v33 = vmul.f32 %v729_v45, %v2447_v51  ;;  %v738_v54 = vadd.f32 %v1409_v55, %v1408_v52 }
  0xba   : > { %v1412_v3 = vsel %vm754_vm6, 1.0, %v1764_v8  ;;  %v1413_v41 = vsel %vm757_vm7, 1.0, %v1764_v8  ;;  %v741_v21 = vmul.f32 %v740_v35, %v2447_v51  ;;  %vm765_vm8 = vcmp.ge.f32.partialorder %v2447_v51, %v1987_v6 }
  0xbb   : > { %v762_v37 = vsub.f32 %v1412_v3, %v1413_v41  ;;  %vm768_vm9 = vcmp.ge.f32.partialorder %v2465_v24, %v1987_v6  ;;  %v2530_v39 = vadd.f32 %v711_v63, %v2405_v59  ;;  %v749_v31 = vadd.f32 %v1411_v23, %v1410_v40 }
  0xbc   : > { %vm776_vm10 = vcmp.ge.f32.partialorder %v2447_v51, %v1992_v7  ;;  %vm779_vm11 = vcmp.ge.f32.partialorder %v2465_v24, %v1992_v7  ;;  %v2537_v50 = vadd.f32 %v714_v32, %v2430_v46  ;;  %v2540_v14 = vadd.f32 %v727_v25, %v2433_v36 }
  0xbd   : > { %v752_v34 = vmul.f32 %v751_v57, %v2447_v51  ;;  %v760_v28 = vadd.f32 %v1413_v41, %v1412_v3  ;;  %v2544_v58 = vadd.f32 %v738_v54, %v2450_v38  ;;  %v763_v59 = vmul.f32 %v762_v37, %v2447_v51 }
  0xbe   : > { %v1414_v60 = vsel %vm765_vm8, 1.0, %v1764_v8  ;;  %v1415_v53 = vsel %vm768_vm9, 1.0, %v1764_v8  ;;  %v2550_v9 = vadd.f32 %v730_v33, %v2437_v43  ;;  %v2553_v46 = vadd.f32 %v741_v21, %v2457_v62 }
  0xbf   : > { %v1416_v36 = vsel %vm776_vm10, 1.0, %v1764_v8  ;;  %v1417_v22 = vsel %vm779_vm11, 1.0, %v1764_v8  ;;  %v2558_v11 = vadd.f32 %v749_v31, %v2453_v29  ;;  %v773_v38 = vsub.f32 %v1414_v60, %v1415_v53 }
  0xc0   : > { %vm787_vm12 = vcmp.ge.f32.partialorder %v2447_v51, %v2013_v19  ;;  %vm790_vm13 = vcmp.ge.f32.partialorder %v2465_v24, %v2013_v19  ;;  %v2567_v43 = vadd.f32 %v752_v34, %v2462_v44  ;;  %v2570_v62 = vadd.f32 %v760_v28, %v2468_v30 }
  0xc1   : > { %v771_v56 = vadd.f32 %v1415_v53, %v1414_v60  ;;  %vm798_vm14 = vcmp.ge.f32.partialorder %v2447_v51, %v2026_v27  ;;  %v2575_v29 = vadd.f32 %v763_v59, %v2470_v13  ;;  %v782_v48 = vadd.f32 %v1417_v22, %v1416_v36 }
  0xc2   : > { %v784_v10 = vsub.f32 %v1416_v36, %v1417_v22  ;;  %vm801_vm15 = vcmp.ge.f32.partialorder %v2465_v24, %v2026_v27  ;;  %v1418_v20 = vsel %vm787_vm12, 1.0, %v1764_v8  ;;  %v1419_v44 = vsel %vm790_vm13, 1.0, %v1764_v8 }
  0xc3   : > { %v2582_v12 = vsub.f32 0.0, %v2564_v26  ;;  %vm814_vm0 = vcmp.ge.f32.partialorder %v2564_v26, %v1960_v0  ;;  %v774_v30 = vmul.f32 %v773_v38, %v2447_v51  ;;  %v795_v17 = vsub.f32 %v1418_v20, %v1419_v44 }
  0xc4   : > { %v1420_v13 = vsel %vm798_vm14, 1.0, %v1764_v8  ;;  %v1421_v4 = vsel %vm801_vm15, 1.0, %v1764_v8  ;;  %vm825_vm2 = vcmp.ge.f32.partialorder %v2564_v26, %v1963_v1  ;;  %v785_v24 = vmul.f32 %v784_v10, %v2447_v51  ;;  %v2667_v10 = vld [vmem:[#allocation5 + $0x38] sm:$0xff] }
  0xc5   : > { %v806_v18 = vsub.f32 %v1420_v13, %v1421_v4  ;;  %vm817_vm1 = vcmp.ge.f32.partialorder %v2582_v12, %v1960_v0  ;;  %vm828_vm3 = vcmp.ge.f32.partialorder %v2582_v12, %v1963_v1  ;;  %v793_v45 = vadd.f32 %v1419_v44, %v1418_v20 }
  0xc6   : > { %v1422_v52 = vsel %vm814_vm0, 1.0, %v1764_v8  ;;  %v1423_v55 = vsel %vm817_vm1, 1.0, %v1764_v8  ;;  %v2599_v35 = vadd.f32 %v771_v56, %v2477_v61  ;;  %v1424_v40 = vsel %vm825_vm2, 1.0, %v1764_v8 }
  0xc7   : > { %v822_v63 = vsub.f32 %v1422_v52, %v1423_v55  ;;  %v1425_v23 = vsel %vm828_vm3, 1.0, %v1764_v8  ;;  %v2604_v32 = vadd.f32 %v774_v30, %v2480_v49  ;;  %v2607_v25 = vadd.f32 %v782_v48, %v2492_v47 }
  0xc8   : > { %v796_v57 = vmul.f32 %v795_v17, %v2447_v51  ;;  %vm836_vm4 = vcmp.ge.f32.partialorder %v2564_v26, %v1966_v2  ;;  %v804_v33 = vadd.f32 %v1421_v4, %v1420_v13  ;;  %v807_v61 = vmul.f32 %v806_v18, %v2447_v51 }
  0xc9   : > { %v820_v54 = vadd.f32 %v1423_v55, %v1422_v52  ;;  %vm839_vm5 = vcmp.ge.f32.partialorder %v2582_v12, %v1966_v2  ;;  %v2616_v3 = vadd.f32 %v785_v24, %v2507_v42  ;;  %v2619_v49 = vadd.f32 %v793_v45, %v2502_v15 }
  0xca   : > { %v831_v47 = vadd.f32 %v1425_v23, %v1424_v40  ;;  %v833_v41 = vsub.f32 %v1424_v40, %v1425_v23  ;;  %v823_v21 = vmul.f32 %v822_v63, %v2564_v26  ;;  %v1426_v37 = vsel %vm836_vm4, 1.0, %v1764_v8 }
  0xcb   : > { %v1427_v31 = vsel %vm839_vm5, 1.0, %v1764_v8  ;;  %vm847_vm6 = vcmp.ge.f32.partialorder %v2564_v26, %v1974_v5  ;;  %vm850_vm7 = vcmp.ge.f32.partialorder %v2582_v12, %v1974_v5  ;;  %vm858_vm8 = vcmp.ge.f32.partialorder %v2564_v26, %v1987_v6 }
  0xcc   : > { %v844_v51 = vsub.f32 %v1426_v37, %v1427_v31  ;;  %vm861_vm9 = vcmp.ge.f32.partialorder %v2582_v12, %v1987_v6  ;;  %v2633_v15 = vadd.f32 %v796_v57, %v2514_v16  ;;  %v2636_v42 = vadd.f32 %v804_v33, %v2530_v39 }
  0xcd   : > { %v2639_v34 = vadd.f32 %v807_v61, %v2537_v50  ;;  %v2642_v28 = vadd.f32 %v820_v54, %v2540_v14  ;;  %v1428_v5 = vsel %vm847_vm6, 1.0, %v1764_v8  ;;  %v1429_v59 = vsel %vm850_vm7, 1.0, %v1764_v8 }
  0xce   : > { %v1430_v60 = vsel %vm858_vm8, 1.0, %v1764_v8  ;;  %v1431_v6 = vsel %vm861_vm9, 1.0, %v1764_v8  ;;  %v2649_v16 = vadd.f32 %v823_v21, %v2550_v9  ;;  %v2652_v39 = vadd.f32 %v831_v47, %v2544_v58  ;;  %v2740_v21 = vld [vmem:[%s1949_s8 + $0x18] sm:$0xff] }
  0xcf   : > { %v834_v50 = vmul.f32 %v833_v41, %v2564_v26  ;;  %vm869_vm10 = vcmp.ge.f32.partialorder %v2564_v26, %v1992_v7  ;;  %v842_v14 = vadd.f32 %v1427_v31, %v1426_v37  ;;  %v845_v53 = vmul.f32 %v844_v51, %v2564_v26 }
  0xd0   : > { %vm872_vm11 = vcmp.ge.f32.partialorder %v2582_v12, %v1992_v7  ;;  %vm880_vm12 = vcmp.ge.f32.partialorder %v2564_v26, %v2013_v19  ;;  %v853_v36 = vadd.f32 %v1429_v59, %v1428_v5  ;;  %v855_v9 = vsub.f32 %v1428_v5, %v1429_v59 }
  0xd1   : > { %v864_v22 = vadd.f32 %v1431_v6, %v1430_v60  ;;  %v866_v38 = vsub.f32 %v1430_v60, %v1431_v6  ;;  %v1432_v58 = vsel %vm869_vm10, 1.0, %v1764_v8  ;;  %v1433_v56 = vsel %vm872_vm11, 1.0, %v1764_v8 }
  0xd2   : > { %v1434_v48 = vsel %vm880_vm12, 1.0, %v1764_v8  ;;  %vm883_vm13 = vcmp.ge.f32.partialorder %v2582_v12, %v2013_v19  ;;  %v877_v20 = vsub.f32 %v1432_v58, %v1433_v56  ;;  %vm891_vm14 = vcmp.ge.f32.partialorder %v2564_v26, %v2026_v27 }
  0xd3   : > { %v1435_v7 = vsel %vm883_vm13, 1.0, %v1764_v8  ;;  %vm894_vm15 = vcmp.ge.f32.partialorder %v2582_v12, %v2026_v27  ;;  %v2675_v44 = vadd.f32 %v834_v50, %v2553_v46  ;;  %v2678_v30 = vadd.f32 %v842_v14, %v2558_v11 }
  0xd4   : > { %v2681_v17 = vadd.f32 %v845_v53, %v2567_v43  ;;  %v888_v19 = vsub.f32 %v1434_v48, %v1435_v7  ;;  %v856_v13 = vmul.f32 %v855_v9, %v2564_v26  ;;  %v867_v4 = vmul.f32 %v866_v38, %v2564_v26  ;;  %v2768_v53 = vld [vmem:[%s1949_s8 + $0x28] sm:$0xff]  ;;  %v2779_v38 = vld [vmem:[%s1949_s8 + $0x30] sm:$0xff] }
  0xd5   : > { %v2686_v18 = vsub.f32 0.0, %v2667_v10  ;;  %vm907_vm0 = vcmp.ge.f32.partialorder %v2667_v10, %v1960_v0  ;;  %v2691_v27 = vadd.f32 %v853_v36, %v2570_v62  ;;  %v875_v46 = vadd.f32 %v1433_v56, %v1432_v58 }
  0xd6   : > { %v1436_v11 = vsel %vm891_vm14, 1.0, %v1764_v8  ;;  %v1437_v43 = vsel %vm894_vm15, 1.0, %v1764_v8  ;;  %v2696_v12 = vadd.f32 %v864_v22, %v2599_v35  ;;  %v878_v24 = vmul.f32 %v877_v20, %v2564_v26 }
  0xd7   : > { %v899_v45 = vsub.f32 %v1436_v11, %v1437_v43  ;;  %vm910_vm1 = vcmp.ge.f32.partialorder %v2686_v18, %v1960_v0  ;;  %v886_v52 = vadd.f32 %v1435_v7, %v1434_v48  ;;  %v889_v55 = vmul.f32 %v888_v19, %v2564_v26  ;;  %v2720_v0 = vld [vmem:[%s1949_s8 + $0x10] sm:$0xff]  ;;  %v2788_v19 = vld [vmem:[%s1949_s8 + $0x38] sm:$0xff] }
  0xd8   : > { %v1438_v62 = vsel %vm907_vm0, 1.0, %v1764_v8  ;;  %v1439_v63 = vsel %vm910_vm1, 1.0, %v1764_v8  ;;  %v2705_v40 = vadd.f32 %v856_v13, %v2575_v29  ;;  %v2708_v23 = vadd.f32 %v867_v4, %v2604_v32 }
  0xd9   : > { %v915_v35 = vsub.f32 %v1438_v62, %v1439_v63  ;;  %vm918_vm2 = vcmp.ge.f32.partialorder %v2667_v10, %v1963_v1  ;;  %v2713_v57 = vadd.f32 %v875_v46, %v2607_v25  ;;  %vm921_vm3 = vcmp.ge.f32.partialorder %v2686_v18, %v1963_v1 }
  0xda   : > { %vm929_vm4 = vcmp.ge.f32.partialorder %v2667_v10, %v1966_v2  ;;  %vm932_vm5 = vcmp.ge.f32.partialorder %v2686_v18, %v2720_v0  ;;  %v2725_v29 = vadd.f32 %v878_v24, %v2616_v3  ;;  %v897_v32 = vadd.f32 %v1437_v43, %v1436_v11  ;;  %v1580_v24 = vld [vmem:[%s1949_s8] sm:$0xff] }
  0xdb   : > { %v900_v25 = vmul.f32 %v899_v45, %v2564_v26  ;;  %v913_v33 = vadd.f32 %v1439_v63, %v1438_v62  ;;  %v2729_v61 = vadd.f32 %v886_v52, %v2619_v49  ;;  %v2732_v1 = vadd.f32 %v889_v55, %v2633_v15  ;;  %v2747_v49 = vld [vmem:[%s1949_s8 + $0x20] sm:$0xff] }
  0xdc   : > { %v916_v2 = vmul.f32 %v915_v35, %v2667_v10  ;;  %v1440_v54 = vsel %vm918_vm2, 1.0, %v1764_v8  ;;  %v1441_v47 = vsel %vm921_vm3, 1.0, %v1764_v8  ;;  %v1442_v41 = vsel %vm929_vm4, 1.0, %v1764_v8 }
  0xdd   : > { %v1443_v3 = vsel %vm932_vm5, 1.0, %v1764_v8  ;;  %vm940_vm6 = vcmp.ge.f32.partialorder %v2667_v10, %v2740_v21  ;;  %v926_v26 = vsub.f32 %v1440_v54, %v1441_v47  ;;  %vm943_vm7 = vcmp.ge.f32.partialorder %v2686_v18, %v2740_v21 }
  0xde   : > { %vm951_vm8 = vcmp.ge.f32.partialorder %v2667_v10, %v2747_v49  ;;  %vm954_vm9 = vcmp.ge.f32.partialorder %v2686_v18, %v2747_v49  ;;  %v2754_v37 = vadd.f32 %v897_v32, %v2636_v42  ;;  %v2757_v31 = vadd.f32 %v900_v25, %v2639_v34 }
  0xdf   : > { %v914_v51 = vadd.f32 %v913_v33, %v2642_v28  ;;  %v937_v15 = vsub.f32 %v1442_v41, %v1443_v3  ;;  %v2761_v5 = vadd.f32 %v916_v2, %v2649_v16  ;;  %v924_v59 = vadd.f32 %v1441_v47, %v1440_v54  ;;  %v1581_v33 = vld [vmem:[%s1949_s8 + $0x8] sm:$0xff]  ;;  %s1646_s8 = scalar_lea.vmem %s1645_s7, 256 }
  0xe0   : > { %v935_v60 = vadd.f32 %v1443_v3, %v1442_v41  ;;  %v1444_v6 = vsel %vm940_vm6, 1.0, %v1764_v8  ;;  %v1445_v50 = vsel %vm943_vm7, 1.0, %v1764_v8  ;;  %v1446_v14 = vsel %vm951_vm8, 1.0, %v1764_v8  ;;  %p1648_p11 = scmp.lt.s32.totalorder %s1646_s8, %s1640_s6 }
  0xe1   : > { %v1447_v42 = vsel %vm954_vm9, 1.0, %v1764_v8  ;;  %vm962_vm10 = vcmp.ge.f32.partialorder %v2667_v10, %v2768_v53  ;;  %v927_v34 = vmul.f32 %v926_v26, %v2667_v10  ;;  %v948_v28 = vsub.f32 %v1444_v6, %v1445_v50 }
  0xe2   : > { %v959_v16 = vsub.f32 %v1446_v14, %v1447_v42  ;;  %vm965_vm11 = vcmp.ge.f32.partialorder %v2686_v18, %v2768_v53  ;;  %v938_v36 = vmul.f32 %v937_v15, %v2667_v10  ;;  %v1448_v9 = vsel %vm962_vm10, 1.0, %v1764_v8  ;;  %p1649_p0 = por %p1648_p11, %p1647_p12 }
  0xe3   : > { %v1449_v22 = vsel %vm965_vm11, 1.0, %v1764_v8  ;;  %vm973_vm12 = vcmp.ge.f32.partialorder %v2667_v10, %v2779_v38  ;;  %v925_v58 = vadd.f32 %v924_v59, %v2652_v39  ;;  %v936_v56 = vadd.f32 %v935_v60, %v2678_v30 }
  0xe4   : > { %v946_v48 = vadd.f32 %v1445_v50, %v1444_v6  ;;  %v970_v20 = vsub.f32 %v1448_v9, %v1449_v22  ;;  %v957_v7 = vadd.f32 %v1447_v42, %v1446_v14  ;;  %vm976_vm13 = vcmp.ge.f32.partialorder %v2686_v18, %v2779_v38  ;;  %p1650_p5 = pnand %p1649_p0, %p1643_p8 }
  0xe5   : > { %vm984_vm14 = vcmp.ge.f32.partialorder %v2667_v10, %v2788_v19  ;;  %vm987_vm15 = vcmp.ge.f32.partialorder %v2686_v18, %v2788_v19  ;;  %v949_v13 = vmul.f32 %v948_v28, %v2667_v10  ;;  %v960_v39 = vmul.f32 %v959_v16, %v2667_v10 }
  0xe6   : > { %v1450_v30 = vsel %vm973_vm12, 1.0, %v1764_v8  ;;  %v1451_v4 = vsel %vm976_vm13, 1.0, %v1764_v8  ;;  %v928_v46 = vadd.f32 %v927_v34, %v2675_v44  ;;  %v2800_v11 = vadd.f32 %v938_v36, %v2681_v17 }
  0xe7   : > { %v968_v43 = vadd.f32 %v1449_v22, %v1448_v9  ;;  %vm995_vm0 = vcmp.le.f32.partialorder %v1580_v24, 0.0  ;;  %v971_v45 = vmul.f32 %v970_v20, %v2667_v10  ;;  %v2805_v18 = vsel %vm984_vm14, 1.0, %v1764_v8 }
  0xe8   : > { %v2808_v52 = vsel %vm987_vm15, 1.0, %v1764_v8  ;;  %v1454_v55 = vsel %vm995_vm0, 1.0, %v1764_v8  ;;  %v947_v62 = vadd.f32 %v946_v48, %v2691_v27  ;;  %v958_v44 = vadd.f32 %v957_v7, %v2696_v12 }
  0xe9   : > { %v979_v63 = vadd.f32 %v1451_v4, %v1450_v30  ;;  %v998_v17 = vmul.f32 2.0, %v1454_v55  ;;  %v2814_v35 = vadd.f32 %v949_v13, %v2705_v40  ;;  %v2817_v32 = vadd.f32 %v960_v39, %v2708_v23 }
  0xea   : > { %v981_v25 = vsub.f32 %v1450_v30, %v1451_v4  ;;  %vm1013_vm1 = vcmp.le.f32.partialorder %v1581_v33, 0.0  ;;  %v2821_v2 = vadd.f32 %v968_v43, %v2713_v57  ;;  %v990_v54 = vadd.f32 %v2808_v52, %v2805_v18 }
  0xeb   : > { %v999_v27 = vsub.f32 %v914_v51, %v998_v17  ;;  %v1456_v12 = vsel %vm1013_vm1, 1.0, %v1764_v8  ;;  %v2827_v47 = vadd.f32 %v971_v45, %v2725_v29  ;;  %v992_v40 = vsub.f32 %v2805_v18, %v2808_v52 }
  0xec   : > { %v1016_v23 = vmul.f32 2.0, %v1456_v12  ;;  %vm1031_vm2 = vcmp.le.f32.partialorder %v2720_v0, 0.0  ;;  %v2833_v41 = vadd.f32 %v979_v63, %v2729_v61  ;;  %v2837_v26 = vmul.f32 %v981_v25, %v2667_v10 }
  0xed   : > { %v1000_v57 = vmul.f32 %v1580_v24, %v999_v27  ;;  %1558 = vrcp.f32 %v999_v27  ;;  %v1458_v3 = vsel %vm1031_vm2, 1.0, %v1764_v8  ;;  %vm1049_vm3 = vcmp.le.f32.partialorder %v2740_v21, 0.0 }
  0xee   : > { %v1017_v51 = vsub.f32 %v925_v58, %v1016_v23  ;;  %v1034_v15 = vmul.f32 2.0, %v1458_v3  ;;  %v2841_v29 = vadd.f32 %v990_v54, %v2754_v37  ;;  %vm1004_vm4 = vcmp.gt.f32.partialorder %v1580_v24, -1e+29 }
  0xef   : > { %v1001_v59 = vsub.f32 %v1000_v57, %v2761_v5  ;;  %v1460_v61 = vsel %vm1049_vm3, 1.0, %v1764_v8  ;;  %v1455_v42 = vadd.f32 -1.0, %v2761_v5  ;;  %vm1022_vm5 = vcmp.gt.f32.partialorder %v1581_v33, -1e+29 }
  0xf0   : > { %v1018_v60 = vmul.f32 %v1581_v33, %v1017_v51  ;;  %1560 = vrcp.f32 %v1017_v51  ;;  %v1035_v6 = vsub.f32 %v936_v56, %v1034_v15  ;;  %v1052_v50 = vmul.f32 2.0, %v1460_v61 }
  0xf1   : > { %v1002_v14 = vadd.f32 1.0, %v1001_v59  ;;  %vm1067_vm6 = vcmp.le.f32.partialorder %v2747_v49, 0.0  ;;  %v1457_v28 = vadd.f32 -1.0, %v928_v46  ;;  %vm1040_vm8 = vcmp.gt.f32.partialorder %v2720_v0, -1e+29 }
  0xf2   : > { %v1019_v34 = vsub.f32 %v1018_v60, %v928_v46  ;;  %v1036_v37 = vmul.f32 %v2720_v0, %v1035_v6  ;;  %v1053_v16 = vsub.f32 %v947_v62, %v1052_v50  ;;  %v1462_v36 = vsel %vm1067_vm6, 1.0, %v1764_v8 }
  0xf3   : > { %vm1003_vm7 = vcmp.ge.f32.partialorder %v1002_v14, 0.0  ;;  %vm1085_vm9 = vcmp.le.f32.partialorder %v2768_v53, 0.0  ;;  %1562 = vrcp.f32 %v1035_v6  ;;  %vm1058_vm11 = vcmp.gt.f32.partialorder %v2740_v21, -1e+29 }
  0xf4   : > { %vm1005_vm10 = vmand %vm1003_vm7, %vm1004_vm4  ;;  %v1020_v9 = vadd.f32 1.0, %v1019_v34  ;;  %v1037_v5 = vsub.f32 %v1036_v37, %v2800_v11  ;;  %v1054_v22 = vmul.f32 %v2740_v21, %v1053_v16  ;;  %v1070_v56 = vmul.f32 2.0, %v1462_v36 }
  0xf5   : > { %v1009_v58 = vsel %vm1005_vm10, %v999_v27, 0.0  ;;  %v1464_v48 = vsel %vm1085_vm9, 1.0, %v1764_v8  ;;  %1564 = vrcp.f32 %v1053_v16  ;;  %vm1103_vm0 = vcmp.le.f32.partialorder %v2779_v38, 0.0 }
  0xf6   : > { %vm1010_vm12 = vcmp.gt.f32.partialorder %v1009_v58, 0.0  ;;  %vm1021_vm13 = vcmp.ge.f32.partialorder %v1020_v9, 0.0  ;;  %v1038_v20 = vadd.f32 1.0, %v1037_v5  ;;  %v1055_v7 = vsub.f32 %v1054_v22, %v2814_v35 }
  0xf7   : > { %v1559_v13 = vpop.eup %1558  ;;  %v1012_v39 = vsel %vm1010_vm12, %v1009_v58, 0.0  ;;  %vm1023_vm14 = vmand %vm1021_vm13, %vm1022_vm5  ;;  %v1071_v30 = vsub.f32 %v958_v44, %v1070_v56  ;;  %v1088_v4 = vmul.f32 2.0, %v1464_v48  ;;  %v1459_v44 = vadd.f32 -1.0, %v2800_v11 }
  0xf8   : > { %v1027_v46 = vsel %vm1023_vm14, %v1017_v51, 0.0  ;;  %vm1039_vm15 = vcmp.ge.f32.partialorder %v1038_v20, 0.0  ;;  %v1056_v43 = vadd.f32 1.0, %v1055_v7  ;;  %v1008_v24 = vmul.f32 %v1559_v13, %v1455_v42 }
  0xf9   : > { %vm1028_vm1 = vcmp.gt.f32.partialorder %v1027_v46, %v1012_v39  ;;  %vm1041_vm2 = vmand %vm1039_vm15, %vm1040_vm8  ;;  %v1072_v45 = vmul.f32 %v2747_v49, %v1071_v30  ;;  %v1089_v55 = vsub.f32 %v2821_v2, %v1088_v4  ;;  %1566 = vrcp.f32 %v1071_v30 }
  0xfa   : > { %v1561_v62 = vpop.eup %1560  ;;  %v1030_v63 = vsel %vm1028_vm1, %v1027_v46, %v1012_v39  ;;  %v1045_v17 = vsel %vm1041_vm2, %v1035_v6, 0.0  ;;  %vm1057_vm3 = vcmp.ge.f32.partialorder %v1056_v43, 0.0  ;;  %vm1076_vm6 = vcmp.gt.f32.partialorder %v2747_v49, -1e+29 }
  0xfb   : > { %vm1046_vm4 = vcmp.gt.f32.partialorder %v1045_v17, %v1030_v63  ;;  %vm1059_vm5 = vmand %vm1057_vm3, %vm1058_vm11  ;;  %v1073_v25 = vsub.f32 %v1072_v45, %v2817_v32  ;;  %v1090_v0 = vmul.f32 %v2768_v53, %v1089_v55  ;;  %v1466_v2 = vsel %vm1103_vm0, 1.0, %v1764_v8 }
  0xfc   : > { %v1048_v33 = vsel %vm1046_vm4, %v1045_v17, %v1030_v63  ;;  %v1063_v54 = vsel %vm1059_vm5, %v1053_v16, 0.0  ;;  %v1026_v27 = vmul.f32 %v1561_v62, %v1457_v28  ;;  %1568 = vrcp.f32 %v1089_v55 }
  0xfd   : > { %vm1064_vm7 = vcmp.gt.f32.partialorder %v1063_v54, %v1048_v33  ;;  %v1074_v11 = vadd.f32 1.0, %v1073_v25  ;;  %v1563_v12 = vpop.eup %1562  ;;  %v993_v21 = vmul.f32 %v992_v40, %v2667_v10  ;;  %v1011_v23 = vsel %vm1010_vm12, %v1008_v24, 0.0 }
  0xfe   : > { %v1091_v57 = vsub.f32 %v1090_v0, %v2827_v47  ;;  %v1106_v3 = vmul.f32 2.0, %v1466_v2  ;;  %v983_v51 = vadd.f32 %v2837_v26, %v2732_v1  ;;  %v1461_v15 = vadd.f32 -1.0, %v2814_v35 }
  0xff   : > { %v1066_v59 = vsel %vm1064_vm7, %v1063_v54, %v1048_v33  ;;  %vm1075_vm8 = vcmp.ge.f32.partialorder %v1074_v11, 0.0  ;;  %vm1094_vm10 = vcmp.gt.f32.partialorder %v2768_v53, -1e+29  ;;  %vm1121_vm11 = vcmp.le.f32.partialorder %v2788_v19, 0.0  ;;  %v1565_v18 = vpop.eup %1564 }
 0x100   : > { %vm1077_vm9 = vmand %vm1075_vm8, %vm1076_vm6  ;;  %v1092_v61 = vadd.f32 1.0, %v1091_v57  ;;  %v1107_v10 = vsub.f32 %v2833_v41, %v1106_v3  ;;  %v1029_v52 = vsel %vm1028_vm1, %v1026_v27, %v1011_v23  ;;  %v1044_v40 = vmul.f32 %v1563_v12, %v1459_v44 }
 0x101   : > { %v1081_v1 = vsel %vm1077_vm9, %v1071_v30, 0.0  ;;  %v1468_v35 = vsel %vm1121_vm11, 1.0, %v1764_v8  ;;  %v1463_v49 = vadd.f32 -1.0, %v2817_v32  ;;  %v1062_v6 = vmul.f32 %v1565_v18, %v1461_v15 }
 0x102   : > { %vm1082_vm12 = vcmp.gt.f32.partialorder %v1081_v1, %v1066_v59  ;;  %vm1093_vm13 = vcmp.ge.f32.partialorder %v1092_v61, 0.0  ;;  %v1108_v26 = vmul.f32 %v2779_v38, %v1107_v10  ;;  %1570 = vrcp.f32 %v1107_v10 }
 0x103   : > { %v1084_v53 = vsel %vm1082_vm12, %v1081_v1, %v1066_v59  ;;  %vm1095_vm14 = vmand %vm1093_vm13, %vm1094_vm10  ;;  %v1124_v41 = vmul.f32 2.0, %v1468_v35  ;;  %v1567_v60 = vpop.eup %1566  ;;  %v994_v42 = vadd.f32 %v993_v21, %v2757_v31  ;;  %v1047_v8 = vsel %vm1046_vm4, %v1044_v40, %v1029_v52 }
 0x104   : > { %v1099_v50 = vsel %vm1095_vm14, %v1089_v55, 0.0  ;;  %v1109_v14 = vsub.f32 %v1108_v26, %v983_v51  ;;  %v1465_v28 = vadd.f32 -1.0, %v2827_v47  ;;  %vm1112_vm0 = vcmp.gt.f32.partialorder %v2779_v38, -1e+29 }
 0x105   : > { %vm1100_vm15 = vcmp.gt.f32.partialorder %v1099_v50, %v1084_v53  ;;  %v1125_v34 = vsub.f32 %v2841_v29, %v1124_v41  ;;  %v1080_v16 = vmul.f32 %v1567_v60, %v1463_v49  ;;  %v1065_v9 = vsel %vm1064_vm7, %v1062_v6, %v1047_v8 }
 0x106   : > { %v1110_v37 = vadd.f32 1.0, %v1109_v14  ;;  %v1569_v32 = vpop.eup %1568  ;;  %v1102_v31 = vsel %vm1100_vm15, %v1099_v50, %v1084_v53  ;;  %v1467_v5 = vadd.f32 -1.0, %v983_v51  ;;  %vm1130_vm4 = vcmp.gt.f32.partialorder %v2788_v19, -1e+29 }
 0x107   : > { %v1126_v36 = vmul.f32 %v2788_v19, %v1125_v34  ;;  %1572 = vrcp.f32 %v1125_v34  ;;  %v1098_v22 = vmul.f32 %v1569_v32, %v1465_v28  ;;  %v1083_v58 = vsel %vm1082_vm12, %v1080_v16, %v1065_v9 }
 0x108   : > { %vm1111_vm1 = vcmp.ge.f32.partialorder %v1110_v37, 0.0  ;;  %v1469_v13 = vadd.f32 -1.0, %v994_v42 }
 0x109   : > { %vm1113_vm2 = vmand %vm1111_vm1, %vm1112_vm0  ;;  %v1127_v29 = vsub.f32 %v1126_v36, %v994_v42  ;;  %v1101_v7 = vsel %vm1100_vm15, %v1098_v22, %v1083_v58 }
 0x10a   : > { %v1117_v47 = vsel %vm1113_vm2, %v1107_v10, 0.0 }
 0x10b   : > { %vm1118_vm3 = vcmp.gt.f32.partialorder %v1117_v47, %v1102_v31  ;;  %v1128_v38 = vadd.f32 1.0, %v1127_v29 }
 0x10c   : > { %v1571_v56 = vpop.eup %1570  ;;  %v1120_v20 = vsel %vm1118_vm3, %v1117_v47, %v1102_v31 }
 0x10d   : > { %v1116_v48 = vmul.f32 %v1571_v56, %v1467_v5  ;;  %vm1129_vm5 = vcmp.ge.f32.partialorder %v1128_v38, 0.0 }
 0x10e   : > { %vm1131_vm6 = vmand %vm1129_vm5, %vm1130_vm4 }
 0x10f   : > { %v1135_v39 = vsel %vm1131_vm6, %v1125_v34, 0.0  ;;  %v1119_v30 = vsel %vm1118_vm3, %v1116_v48, %v1101_v7 }
 0x110   : > { %vm1136_vm7 = vcmp.gt.f32.partialorder %v1135_v39, %v1120_v20 }
 0x111   : > { %v1573_v19 = vpop.eup %1572  ;;  %v1138_v4 = vsel %vm1136_vm7, %v1135_v39, %v1120_v20 }
 0x112   : > { %v1134_v46 = vmul.f32 %v1573_v19, %v1469_v13  ;;  %1139 = vst [vmem:[%s235_s24] sm:$0xff] %v1138_v4 }
 0x113   : > { %1653 = shalt.err (!%p1650_p5)
}
 0x114   : > { %s1654_s20 = scalar_lea.hbm %s2915_s25, 128  ;;  %s1658_s18 = scalar_lea.hbm %s2999_s2, 256 }
 0x115   : > { %p1655_p9 = scmp.ne.s32.totalorder %s2915_s25, %s1654_s20  ;;  %p1659_p3 = scmp.lt.u32.totalorder %s2915_s25, %s2999_s2 }
 0x116   : > { %p1660_p7 = scmp.lt.u32.totalorder %s1658_s18, %s1654_s20  ;;  %p1662_p4 = scmp.lt.u32.totalorder %s1654_s20, %s2915_s25 }
 0x117   : > { %p1656_p1 = pnand %p1655_p9, %p1886_p10 }
 0x118   : > { %p1661_p13 = por %p1660_p7, %p1659_p3 }
 0x119   : > { %p1657_p2 = pneg %p1656_p1 }
 0x11a   : > { %p1663_p6 = por %p1662_p4, %p1661_p13 }
 0x11c   : > { %p1664_p8 = pnand %p1663_p6, %p1657_p2 }
 0x11e   : > { %1667 = shalt.err (!%p1664_p8)
}
 0x11f   : > { %1483 = dma.vmem_to_hbm [thread:$0]  (%p1886_p10), %s2917_s10, 128, %s2915_s25, %s1142_s4   ;;  %v1137_v43 = vsel %vm1136_vm7, %v1134_v46, %v1119_v30 }
 0x120   : > { %1140 = vst [vmem:[%s2909_s11] sm:$0xff] %v1137_v43  ;;  %s1147_s26 = scalar_lea.sflag [#allocation9], %s1945_s30  ;;  %s1668_s6 = scalar_lea.vmem %s2926_s9, 128 }
 0x121   : > { %p1669_p12 = scmp.ne.s32.totalorder %s2926_s9, %s1668_s6  ;;  %s1766_s29 = smov [#allocation8]  }
 0x122   : > { %s1672_s7 = sshll.u32 %s1766_s29, 4  ;;  %s1673_s7 = int_to_ptr.vmem [resolvable:$false] %s1672_s7 }
 0x123   : > { %p1670_p11 = pnand %p1669_p12, %p1886_p10  ;;  %s1674_s8 = scalar_lea.vmem %s1673_s7, 256 }
 0x124   : > { %p1675_p5 = scmp.lt.s32.totalorder %s2926_s9, %s1673_s7  ;;  %p1676_p9 = scmp.lt.s32.totalorder %s1674_s8, %s1668_s6 }
 0x125   : > { %p1671_p0 = pneg %p1670_p11 }
 0x126   : > { %p1677_p1 = por %p1676_p9, %p1675_p5 }
 0x128   : > { %p1678_p2 = pnand %p1677_p1, %p1671_p0 }
 0x12a   : > { %1681 = shalt.err (!%p1678_p2)
}
 0x12b   : > { %s1682_s30 = scalar_lea.hbm %s2924_s21, 128  ;;  %s1686_s25 = scalar_lea.hbm %s3000_s3, 256 }
 0x12c   : > { %p1683_p3 = scmp.ne.s32.totalorder %s2924_s21, %s1682_s30  ;;  %p1687_p4 = scmp.lt.u32.totalorder %s2924_s21, %s3000_s3 }
 0x12d   : > { %p1688_p6 = scmp.lt.u32.totalorder %s1686_s25, %s1682_s30  ;;  %p1690_p12 = scmp.lt.u32.totalorder %s1682_s30, %s2924_s21 }
 0x12e   : > { %p1684_p7 = pnand %p1683_p3, %p1886_p10 }
 0x12f   : > { %p1689_p8 = por %p1688_p6, %p1687_p4 }
 0x130   : > { %p1685_p13 = pneg %p1684_p7 }
 0x131   : > { %p1691_p11 = por %p1690_p12, %p1689_p8 }
 0x133   : > { %p1692_p0 = pnand %p1691_p11, %p1685_p13 }
 0x135   : > { %1695 = shalt.err (!%p1692_p0)
}
 0x136   : > { %1484 = dma.vmem_to_hbm [thread:$0]  (%p1886_p10), %s2926_s9, 128, %s2924_s21, %s1147_s26  }
 0x137 PF: > { %s1189_s22 = sand.u32 1, %s1738_s12   ;;  %p3018_p5 = scmp.ne.s32.totalorder %s3008_s23, 0 }
 0x138   : > { %p3019_p9 = scmp.ge.s32.totalorder %s1758_s17, 2  ;;  %s1190_s24 = scalar_lea.sflag [#allocation4], %s1189_s22 }
 0x13a   : > { %p1496_p1 = pnand %p3019_p9, %p3018_p5 }
 0x13c   : > { %1729 = dma.done.wait (!%p1496_p1), %s1190_s24, 128  }
 0x13d   : > { %1731 = vsyncadd (!%p1496_p1), %s1190_s24, 4294967168  ;;  %s1199_s18 = scalar_lea.sflag [#allocation9], %s1189_s22 }
 0x13e   : > { %1733 = dma.done.wait (!%p1496_p1), %s1199_s18, 128  }
 0x13f   : > { %1735 = vsyncadd (!%p1496_p1), %s1199_s18, 4294967168  ;;  %s24_s17 = sadd.s32 1, %s1758_s17   ;;  %s3020_s12 = smov %s1742_s13 }
 0x140   : > { %p21_p2 = scmp.ge.s32.totalorder %s24_s17, 4   ;;  %s3021_s13 = smov %s1746_s14 }
 0x141   : > { %s3022_s14 = smov %s1895_s5  ;;  %s3023_s15 = smov %s1754_s16 }
 0x142   : > { %s3024_s16 = smov %s3026_s28  ;;  %23 = sbr.rel (!%p21_p2) target bundleno = 9 (0x9), region = 104 }
 0x149   :  { %1204 = vsyncpa [#allocation3], 1 }
 0x14a   :  { %1206 = vsyncpa [#allocation3 + $0x1], 1 }
 0x14b   :  { %1207 = vsyncpa [#allocation6], 1 }
 0x14c   :  { %1208 = vsyncpa [#allocation4], 1 }
 0x14d   :  { %1210 = vsyncpa [#allocation4 + $0x1], 1 }
 0x14e   :  { %1211 = vsyncpa [#allocation9], 1 }
 0x14f   :  { %1213 = vsyncpa [#allocation9 + $0x1], 1 }

</bundles_post_ra>
